<compile_context>
chip_gen: v7x
topology: tpu7x:2x2x1
jax: 0.10.0
libtpu: 0.0.40
codegen_flags: <defaults>
</compile_context>

<pallas_src>
import jax
import jax.numpy as jnp
from jax.experimental import pallas as pl
from jax.experimental.pallas import tpu as pltpu

EPS = 1e-5


def fused_se_conv_bn_kernel(xse_ref, w1_ref, x_ref, w2_ref, gb_ref, out_ref):
    # --- SE branch: conv2d21 (1x1, 30->120, bias) + sigmoid -----------------
    # xse_ref: [31, 1] (input with trailing constant 1.0 for the bias),
    # w1_ref:  [31, 120] (transposed weight with bias as last row).
    # VPU broadcast-mul + sublane (XLU) reduce -> gate as a [1, 120] row,
    # exactly the shape needed to scale W2's input-channel columns.
    se_row = jnp.sum(w1_ref[...] * xse_ref[...], axis=0, keepdims=True)  # [1,120]
    s_row = jax.nn.sigmoid(se_row)                                       # [1,120]

    # --- fold gate into W2 (per-input-channel scale commutes through the
    #     contraction), then conv2d22 (1x1, 120->120, no bias) as a matmul ---
    w2s = w2_ref[...] * s_row                                            # [120,120]
    # Stage the matmul result straight into out_ref (VMEM): it cannot live in
    # the 64-vreg file anyway.
    out_ref[...] = jnp.dot(w2s, x_ref[...],
                           preferred_element_type=jnp.float32)           # [120,784]

    # --- BatchNorm2d, training mode, single-pass statistics -----------------
    # Biased variance (divide by n, no Bessel correction) matches PyTorch's
    # normalization in training mode — do not "fix".
    x68 = out_ref[...]
    inv_n = 1.0 / x68.shape[1]
    s1 = jnp.sum(x68, axis=1, keepdims=True)                             # [120,1]
    s2 = jnp.sum(x68 * x68, axis=1, keepdims=True)                       # [120,1]
    mean = s1 * inv_n
    var = jnp.maximum(s2 * inv_n - mean * mean, 0.0)                     # clamp >= 0
    gamma = gb_ref[:, 0:1]                                               # [120,1]
    beta = gb_ref[:, 1:2]                                                # [120,1]
    a = jax.lax.rsqrt(var + EPS) * gamma                                 # [120,1]
    b = beta - mean * a                                                  # [120,1]

    # FMA epilogue, in place (re-read from VMEM so nothing full-size stays
    # live across the reductions).
    out_ref[...] = out_ref[...] * a + b


def fused_forward(x64, x61, w1, b1, w2, gamma, beta):
    """x64: [1, 30, 1, 1]  x61: [1, 120, 28, 28]  (NCHW, float32)."""
    N, C_se, _, _ = x64.shape
    _, C, H, W = x61.shape
    HW = H * W  # N == 1

    # --- tiny, one-off parameter re-packing (each <= ~60 KiB) ---------------
    # SE weight pre-transposed to [C_se, C] and bias appended as the last row;
    # the matching SE input gets a trailing constant 1.0 (bias absorbed).
    w1_t = w1.reshape(C, C_se).T                                   # [30, 120]
    w1_aug = jnp.concatenate([w1_t, b1.reshape(1, C)], axis=0)     # [31, 120]
    xse_aug = jnp.concatenate(
        [x64.reshape(C_se), jnp.ones((1,), x64.dtype)]).reshape(C_se + 1, 1)

    # Free views — no transposes on the big tensor.
    x = x61.reshape(C, HW)                                         # [120, 784]
    w2_m = w2.reshape(C, C)                                        # [120, 120] (out, in)
    gb = jnp.stack([gamma, beta], axis=1)                          # [120, 2]

    vmem = pl.BlockSpec(memory_space=pltpu.MemorySpace.VMEM)
    bytes_accessed = (2 * C * HW + C * C + (C_se + 1) * C
                      + (C_se + 1) + 2 * C) * 4
    out = pl.pallas_call(
        fused_se_conv_bn_kernel,
        out_shape=jax.ShapeDtypeStruct((C, HW), jnp.float32),
        in_specs=[vmem] * 5,
        out_specs=vmem,
        cost_estimate=pl.CostEstimate(
            flops=2 * HW * C * C            # main matmul
                  + 2 * (C_se + 1) * C      # SE branch
                  + 6 * C * HW,             # sumsq + FMA epilogue
            transcendentals=2 * C,          # sigmoid + rsqrt, per channel
            bytes_accessed=bytes_accessed),
    )(xse_aug, w1_aug, x, w2_m, gb)

    # Back to NCHW — free reshape, no transpose.
    return out.reshape(N, C, H, W)


def reference_forward(x64, x61, w1, b1, w2, gamma, beta):
    """Pure-JAX reference mirroring the PyTorch module in training mode."""
    C, C_se = w1.shape[0], w1.shape[1]
    se = jnp.einsum('oc,nc->no', w1.reshape(C, C_se), x64.reshape(1, C_se)) + b1
    s = jax.nn.sigmoid(se)[:, :, None, None]                 # [1,120,1,1]
    x67 = x61 * s
    x68 = jnp.einsum('oc,nchw->nohw', w2.reshape(C, C), x67)
    mean = x68.mean(axis=(0, 2, 3), keepdims=True)
    var = ((x68 - mean) ** 2).mean(axis=(0, 2, 3), keepdims=True)
    return (gamma[None, :, None, None] * (x68 - mean) /
            jnp.sqrt(var + EPS) + beta[None, :, None, None])


if __name__ == "__main__":
    key = jax.random.PRNGKey(0)
    k_x64, k_x61, k_w1, k_b1, k_w2 = jax.random.split(key, 5)

    # module-implied shapes
    x64 = jax.random.normal(k_x64, (1, 30, 1, 1), dtype=jnp.float32)
    x61 = jax.random.normal(k_x61, (1, 120, 28, 28), dtype=jnp.float32)

    # deterministic synthetic parameters (shapes from the module __init__)
    w1 = jax.random.normal(k_w1, (120, 30, 1, 1), dtype=jnp.float32) * 0.1
    b1 = jax.random.normal(k_b1, (120,), dtype=jnp.float32) * 0.1
    w2 = jax.random.normal(k_w2, (120, 120, 1, 1), dtype=jnp.float32) * 0.1
    gamma = jnp.ones((120,), dtype=jnp.float32)   # PyTorch BN default init
    beta = jnp.zeros((120,), dtype=jnp.float32)

    out = fused_forward(x64, x61, w1, b1, w2, gamma, beta)
    out = jax.block_until_ready(out)

    ref = reference_forward(x64, x61, w1, b1, w2, gamma, beta)
    assert out.shape == (1, 120, 28, 28)
    assert jnp.allclose(out, ref, atol=1e-4, rtol=1e-4), "mismatch vs reference"

    print("KERNEL_OK")
</pallas_src>

<mosaic_0001>
module attributes {stable_mosaic.version = 11 : i64} {
  func.func @fused_se_conv_bn_kernel(%arg0: memref<31x1xf32, #tpu.memory_space<vmem>>, %arg1: memref<31x120xf32, #tpu.memory_space<vmem>>, %arg2: memref<120x784xf32, #tpu.memory_space<vmem>>, %arg3: memref<120x120xf32, #tpu.memory_space<vmem>>, %arg4: memref<120x2xf32, #tpu.memory_space<vmem>>, %arg5: memref<120x784xf32, #tpu.memory_space<vmem>>) attributes {dimension_semantics = [], scalar_prefetch = 0 : i64, scratch_operands = 0 : i64, tpu.core_type = #tpu.core_type<tc>} {
    %c0 = arith.constant 0 : index
    %c0_0 = arith.constant 0 : index
    %0 = vector.load %arg1[%c0, %c0_0] : memref<31x120xf32, #tpu.memory_space<vmem>>, vector<31x120xf32>
    %c0_1 = arith.constant 0 : index
    %c0_2 = arith.constant 0 : index
    %1 = vector.load %arg0[%c0_1, %c0_2] : memref<31x1xf32, #tpu.memory_space<vmem>>, vector<31x1xf32>
    %2 = vector.broadcast %1 : vector<31x1xf32> to vector<31x120xf32>
    %3 = arith.mulf %0, %2 : vector<31x120xf32>
    %cst = arith.constant dense<0.000000e+00> : vector<120xf32>
    %4 = vector.multi_reduction <add>, %3, %cst [0] : vector<31x120xf32> to vector<120xf32>
    %5 = vector.shape_cast %4 : vector<120xf32> to vector<1x120xf32>
    %6 = arith.negf %5 : vector<1x120xf32>
    %7 = math.exp %6 : vector<1x120xf32>
    %cst_3 = arith.constant 1.000000e+00 : f32
    %8 = vector.broadcast %cst_3 : f32 to vector<1x120xf32>
    %9 = arith.addf %8, %7 : vector<1x120xf32>
    %10 = arith.divf %8, %9 : vector<1x120xf32>
    %c0_4 = arith.constant 0 : index
    %c0_5 = arith.constant 0 : index
    %11 = vector.load %arg3[%c0_4, %c0_5] : memref<120x120xf32, #tpu.memory_space<vmem>>, vector<120x120xf32>
    %12 = vector.broadcast %10 : vector<1x120xf32> to vector<120x120xf32>
    %13 = arith.mulf %11, %12 : vector<120x120xf32>
    %c0_6 = arith.constant 0 : index
    %c0_7 = arith.constant 0 : index
    %14 = vector.load %arg2[%c0_6, %c0_7] : memref<120x784xf32, #tpu.memory_space<vmem>>, vector<120x784xf32>
    %cst_8 = arith.constant dense<0.000000e+00> : vector<120x784xf32>
    %15 = tpu.matmul %13, %14, %cst_8 {dimension_numbers = #tpu.dot_dimension_numbers<[1], [0], [0], [1], [0, 0, 1, 1], [], []>} : vector<120x120xf32>, vector<120x784xf32>, vector<120x784xf32> -> vector<120x784xf32>
    %c0_9 = arith.constant 0 : index
    %c0_10 = arith.constant 0 : index
    %16 = vector.load %arg5[%c0_9, %c0_10] : memref<120x784xf32, #tpu.memory_space<vmem>>, vector<120x784xf32>
    tpu.vector_store %arg5[%c0_9, %c0_10], %15 {strides = array<i32>} : memref<120x784xf32, #tpu.memory_space<vmem>>, vector<120x784xf32>,
    %c0_11 = arith.constant 0 : index
    %c0_12 = arith.constant 0 : index
    %17 = vector.load %arg5[%c0_11, %c0_12] : memref<120x784xf32, #tpu.memory_space<vmem>>, vector<120x784xf32>
    %cst_13 = arith.constant dense<0.000000e+00> : vector<120xf32>
    %18 = vector.multi_reduction <add>, %17, %cst_13 [1] : vector<120x784xf32> to vector<120xf32>
    %19 = vector.shape_cast %18 : vector<120xf32> to vector<120x1xf32>
    %20 = arith.mulf %17, %17 : vector<120x784xf32>
    %cst_14 = arith.constant dense<0.000000e+00> : vector<120xf32>
    %21 = vector.multi_reduction <add>, %20, %cst_14 [1] : vector<120x784xf32> to vector<120xf32>
    %22 = vector.shape_cast %21 : vector<120xf32> to vector<120x1xf32>
    %cst_15 = arith.constant 0.00127551018 : f32
    %23 = vector.broadcast %cst_15 : f32 to vector<120x1xf32>
    %24 = arith.mulf %19, %23 : vector<120x1xf32>
    %cst_16 = arith.constant 0.00127551018 : f32
    %25 = vector.broadcast %cst_16 : f32 to vector<120x1xf32>
    %26 = arith.mulf %22, %25 : vector<120x1xf32>
    %27 = arith.mulf %24, %24 : vector<120x1xf32>
    %28 = arith.subf %26, %27 : vector<120x1xf32>
    %cst_17 = arith.constant 0.000000e+00 : f32
    %29 = vector.broadcast %cst_17 : f32 to vector<120x1xf32>
    %30 = arith.maximumf %28, %29 : vector<120x1xf32>
    %c0_18 = arith.constant 0 : index
    %c0_19 = arith.constant 0 : index
    %31 = vector.load %arg4[%c0_18, %c0_19] : memref<120x2xf32, #tpu.memory_space<vmem>>, vector<120x1xf32>
    %c0_20 = arith.constant 0 : index
    %c1 = arith.constant 1 : index
    %32 = vector.load %arg4[%c0_20, %c1] : memref<120x2xf32, #tpu.memory_space<vmem>>, vector<120x1xf32>
    %cst_21 = arith.constant 9.99999974E-6 : f32
    %33 = vector.broadcast %cst_21 : f32 to vector<120x1xf32>
    %34 = arith.addf %30, %33 : vector<120x1xf32>
    %35 = math.rsqrt %34 : vector<120x1xf32>
    %36 = arith.mulf %35, %31 : vector<120x1xf32>
    %37 = arith.mulf %24, %36 : vector<120x1xf32>
    %38 = arith.subf %32, %37 : vector<120x1xf32>
    %c0_22 = arith.constant 0 : index
    %c0_23 = arith.constant 0 : index
    %39 = vector.load %arg5[%c0_22, %c0_23] : memref<120x784xf32, #tpu.memory_space<vmem>>, vector<120x784xf32>
    %40 = vector.broadcast %36 : vector<120x1xf32> to vector<120x784xf32>
    %41 = arith.mulf %39, %40 : vector<120x784xf32>
    %42 = vector.broadcast %38 : vector<120x1xf32> to vector<120x784xf32>
    %43 = arith.addf %41, %42 : vector<120x784xf32>
    %c0_24 = arith.constant 0 : index
    %c0_25 = arith.constant 0 : index
    %44 = vector.load %arg5[%c0_24, %c0_25] : memref<120x784xf32, #tpu.memory_space<vmem>>, vector<120x784xf32>
    tpu.vector_store %arg5[%c0_24, %c0_25], %43 {strides = array<i32>} : memref<120x784xf32, #tpu.memory_space<vmem>>, vector<120x784xf32>,
    return
  }
}

</mosaic_0001>

<bundles_post_ra>
// kernel: tpu_custom_call.1
= control target key start
LH: loop header
LB: loop body
LE: loop exit
PB: predicated region body
PF: predicated region fallthrough
CT: control target
= control target key end

     0   :  { %v2472_v0 = vmov 0   ;;  %vm52_vm0 = vcmask 982016   ;;  %vm58_vm1 = vcmask 980992   ;;  %vm2475_vm2 = vmmov 0   ;;  %s2476_s29 = smov 1   ;;  %s4731_s0 = inlined_call_operand.vmem [shape: f32[31,1], index: 0, kind: input, shape index: {}]   ;;  %s4732_s2 = inlined_call_operand.vmem [shape: f32[120,784], index: 2, kind: input, shape index: {}]   ;;  %s4733_s1 = inlined_call_operand.vmem [shape: f32[31,120], index: 1, kind: input, shape index: {}]   ;;  %s4734_s3 = inlined_call_operand.vmem [shape: f32[120,120], index: 3, kind: input, shape index: {}]   ;;  %s4735_s5 = inlined_call_operand.vmem [shape: f32[120,784], index: 5, kind: output, shape index: {}]   ;;  %s4736_s4 = inlined_call_operand.vmem [shape: f32[120,2], index: 4, kind: input, shape index: {}]  }
   0x1   :  { %2416 = vset.pattern.permute.xlu1 %v2472_v0  ;;  %2415 = vset.pattern.permute.xlu0 %v2472_v0  ;;  %v26_v1 = vld [vmem:[%s4731_s0 + $0x10] sm:$0xff]  ;;  %v24_v2 = vld [vmem:[%s4731_s0] sm:$0xff]  ;;  %v27_v3 = vld [vmem:[%s4731_s0 + $0x18] sm:$0x7f]  ;;  %vm864_vm3 = vcmask 130048  }
   0x2   :  { %40 = vperm.xlu1 %2416, %v26_v1   ;;  %30 = vperm.xlu0 %2415, %v24_v2   ;;  %v25_v4 = vld [vmem:[%s4731_s0 + $0x8] sm:$0xff]  ;;  %v111_v6 = vld [vmem:[%s4732_s2 + $0x40] sm:$0xff]  ;;  %v106_v7 = vld [vmem:[%s4732_s2 + $0x18] sm:$0xff] }
   0x3   :  { %v104_v5 = vld [vmem:[%s4732_s2 + $0x8] sm:$0xff]  ;;  %v103_v9 = vld [vmem:[%s4732_s2] sm:$0xff]  ;;  %v110_v10 = vld [vmem:[%s4732_s2 + $0x38] sm:$0xff] }
   0x4   :  { %v2304_v8 = vpack.c.bf16 %v111_v6, %v104_v5  ;;  %v113_v11 = vld [vmem:[%s4732_s2 + $0x50] sm:$0xff]  ;;  %v2306_v12 = vpack.c.bf16 %v110_v10, %v103_v9  ;;  %v112_v15 = vld [vmem:[%s4732_s2 + $0x48] sm:$0xff]  ;;  %v118_v17 = vld [vmem:[%s4732_s2 + $0x78] sm:$0xff] }
   0x5   :  { %v2332_v13 = vpack.c.bf16 %v113_v11, %v106_v7  ;;  %v105_v14 = vld [vmem:[%s4732_s2 + $0x10] sm:$0xff]  ;;  %v120_v19 = vld [vmem:[%s4732_s2 + $0x88] sm:$0xff]  ;;  %v127_v23 = vld [vmem:[%s4732_s2 + $0xc0] sm:$0xff] }
   0x6   :  { %45 = vperm.xlu1 %2416, %v27_v3   ;;  %35 = vperm.xlu0 %2415, %v25_v4   ;;  %v2334_v16 = vpack.c.bf16 %v112_v15, %v105_v14  ;;  %v125_v18 = vld [vmem:[%s4732_s2 + $0xb0] sm:$0xff]  ;;  %v124_v22 = vld [vmem:[%s4732_s2 + $0xa8] sm:$0xff]  ;;  %v2336_v25 = vpack.c.bf16 %v127_v23, %v120_v19  ;;  %v119_v26 = vld [vmem:[%s4732_s2 + $0x80] sm:$0xff] }
   0x7   :  { %2305 = vmatprep.subr.bf16.mxu0 %v2304_v8  ;;  %2333 = vmatprep.subr.bf16.mxu1 %v2332_v13  ;;  %v2308_v20 = vpack.c.bf16 %v125_v18, %v118_v17  ;;  %v117_v21 = vld [vmem:[%s4732_s2 + $0x70] sm:$0xff]  ;;  %v126_v27 = vld [vmem:[%s4732_s2 + $0xb8] sm:$0xff]  ;;  %v132_v29 = vld [vmem:[%s4732_s2 + $0xe8] sm:$0xff]  ;;  %v2473_v8 = vmov 0.0  }
   0x8   :  { %2307 = vmatpush1.bf16.msra.mxu0 %v2306_v12  ;;  %2335 = vmatpush1.bf16.msra.mxu1 %v2334_v16  ;;  %v2310_v24 = vpack.c.bf16 %v124_v22, %v117_v21  ;;  %v2338_v28 = vpack.c.bf16 %v126_v27, %v119_v26  ;;  %v139_v30 = vld [vmem:[%s4732_s2 + $0x120] sm:$0xff]  ;;  %v134_v31 = vld [vmem:[%s4732_s2 + $0xf8] sm:$0xff]  ;;  %v141_v35 = vld [vmem:[%s4732_s2 + $0x130] sm:$0xff] }
   0x9   :  { %2309 = vmatprep.subr.bf16.mxu0 %v2308_v20  ;;  %2337 = vmatprep.subr.bf16.mxu1 %v2336_v25  ;;  %v2312_v32 = vpack.c.bf16 %v139_v30, %v132_v29  ;;  %v131_v33 = vld [vmem:[%s4732_s2 + $0xe0] sm:$0xff]  ;;  %v138_v34 = vld [vmem:[%s4732_s2 + $0x118] sm:$0xff]  ;;  %v2340_v37 = vpack.c.bf16 %v141_v35, %v134_v31  ;;  %v133_v38 = vld [vmem:[%s4732_s2 + $0xf0] sm:$0xff] }
   0xa   :  { %v2314_v36 = vpack.c.bf16 %v138_v34, %v131_v33  ;;  %v140_v39 = vld [vmem:[%s4732_s2 + $0x128] sm:$0xff]  ;;  %v146_v41 = vld [vmem:[%s4732_s2 + $0x158] sm:$0xff]  ;;  %v153_v42 = vld [vmem:[%s4732_s2 + $0x190] sm:$0xff]  ;;  %317 = vmatprep.mubr.f32.mxu0 %v2473_v8  ;;  %472 = vmatprep.mubr.f32.mxu1 %v2473_v8  ;;  %v2474_v33 = vmov 0.0|0.0  }
   0xb   :  { %v2342_v40 = vpack.c.bf16 %v140_v39, %v133_v38  ;;  %v148_v43 = vld [vmem:[%s4732_s2 + $0x168] sm:$0xff]  ;;  %v2316_v44 = vpack.c.bf16 %v153_v42, %v146_v41  ;;  %v145_v45 = vld [vmem:[%s4732_s2 + $0x150] sm:$0xff]  ;;  %v155_v47 = vld [vmem:[%s4732_s2 + $0x1a0] sm:$0xff] }
   0xc   :  { %2311 = vmatpush1.bf16.msra.mxu0 %v2310_v24  ;;  %2339 = vmatpush1.bf16.msra.mxu1 %v2338_v28  ;;  %v152_v46 = vld [vmem:[%s4732_s2 + $0x188] sm:$0xff]  ;;  %v2344_v49 = vpack.c.bf16 %v155_v47, %v148_v43  ;;  %v147_v50 = vld [vmem:[%s4732_s2 + $0x160] sm:$0xff]  ;;  %v154_v51 = vld [vmem:[%s4732_s2 + $0x198] sm:$0xff] }
   0xd   :  { %2313 = vmatprep.subr.bf16.mxu0 %v2312_v32  ;;  %2341 = vmatprep.subr.bf16.mxu1 %v2340_v37  ;;  %v2318_v48 = vpack.c.bf16 %v152_v46, %v145_v45  ;;  %v2346_v52 = vpack.c.bf16 %v154_v51, %v147_v50  ;;  %v160_v53 = vld [vmem:[%s4732_s2 + $0x1c8] sm:$0xff]  ;;  %v167_v54 = vld [vmem:[%s4732_s2 + $0x200] sm:$0xff]  ;;  %v162_v55 = vld [vmem:[%s4732_s2 + $0x1d8] sm:$0xff] }
   0xe   :  { %v2320_v56 = vpack.c.bf16 %v167_v54, %v160_v53  ;;  %v159_v57 = vld [vmem:[%s4732_s2 + $0x1c0] sm:$0xff]  ;;  %v166_v58 = vld [vmem:[%s4732_s2 + $0x1f8] sm:$0xff]  ;;  %v169_v59 = vld [vmem:[%s4732_s2 + $0x210] sm:$0xff] }
   0xf   :  { %v2322_v60 = vpack.c.bf16 %v166_v58, %v159_v57  ;;  %v2348_v61 = vpack.c.bf16 %v169_v59, %v162_v55  ;;  %v161_v62 = vld [vmem:[%s4732_s2 + $0x1d0] sm:$0xff]  ;;  %v168_v63 = vld [vmem:[%s4732_s2 + $0x208] sm:$0xff]  ;;  %v174_v1 = vld [vmem:[%s4732_s2 + $0x238] sm:$0xff] }
  0x10   :  { %2315 = vmatpush1.bf16.msra.mxu0 %v2314_v36  ;;  %2343 = vmatpush1.bf16.msra.mxu1 %v2342_v40  ;;  %v2350_v0 = vpack.c.bf16 %v168_v63, %v161_v62  ;;  %v181_v2 = vld [vmem:[%s4732_s2 + $0x270] sm:$0xff]  ;;  %v180_v5 = vld [vmem:[%s4732_s2 + $0x268] sm:$0xff]  ;;  %v183_v7 = vld [vmem:[%s4732_s2 + $0x280] sm:$0xff] }
  0x11   :  { %2317 = vmatprep.subr.bf16.mxu0 %v2316_v44  ;;  %2345 = vmatprep.subr.bf16.mxu1 %v2344_v49  ;;  %v173_v3 = vld [vmem:[%s4732_s2 + $0x230] sm:$0xff]  ;;  %v2324_v4 = vpack.c.bf16 %v181_v2, %v174_v1  ;;  %v176_v6 = vld [vmem:[%s4732_s2 + $0x248] sm:$0xff]  ;;  %v175_v11 = vld [vmem:[%s4732_s2 + $0x240] sm:$0xff] }
  0x12   :  { %v2326_v9 = vpack.c.bf16 %v180_v5, %v173_v3  ;;  %v2352_v10 = vpack.c.bf16 %v183_v7, %v176_v6  ;;  %v182_v12 = vld [vmem:[%s4732_s2 + $0x278] sm:$0xff]  ;;  %v188_v13 = vld [vmem:[%s4732_s2 + $0x2a8] sm:$0xff]  ;;  %v195_v15 = vld [vmem:[%s4732_s2 + $0x2e0] sm:$0xff] }
  0x13   :  { %v2354_v14 = vpack.c.bf16 %v182_v12, %v175_v11  ;;  %v187_v16 = vld [vmem:[%s4732_s2 + $0x2a0] sm:$0xff]  ;;  %v194_v17 = vld [vmem:[%s4732_s2 + $0x2d8] sm:$0xff]  ;;  %v2328_v18 = vpack.c.bf16 %v195_v15, %v188_v13  ;;  %v197_v21 = vld [vmem:[%s4732_s2 + $0x2f0] sm:$0xff] }
  0x14   :  { %2319 = vmatpush1.bf16.msra.mxu0 %v2318_v48  ;;  %2347 = vmatpush1.bf16.msra.mxu1 %v2346_v52  ;;  %v2330_v19 = vpack.c.bf16 %v194_v17, %v187_v16  ;;  %v190_v20 = vld [vmem:[%s4732_s2 + $0x2b8] sm:$0xff]  ;;  %v189_v22 = vld [vmem:[%s4732_s2 + $0x2b0] sm:$0xff]  ;;  %v196_v24 = vld [vmem:[%s4732_s2 + $0x2e8] sm:$0xff] }
  0x15   :  { %2321 = vmatprep.subr.bf16.mxu0 %v2320_v56  ;;  %2349 = vmatprep.subr.bf16.mxu1 %v2348_v61  ;;  %v2356_v23 = vpack.c.bf16 %v197_v21, %v190_v20  ;;  %v2358_v25 = vpack.c.bf16 %v196_v24, %v189_v22  ;;  %v202_v26 = vld [vmem:[%s4732_s2 + $0x318] sm:$0xff]  ;;  %v108_v27 = vld [vmem:[%s4732_s2 + $0x28] sm:$0xff]  ;;  %v115_v29 = vld [vmem:[%s4732_s2 + $0x60] sm:$0xff] }
  0x16   :  { %v204_v28 = vld [vmem:[%s4732_s2 + $0x328] sm:$0xff]  ;;  %v201_v30 = vld [vmem:[%s4732_s2 + $0x310] sm:$0xff]  ;;  %v2360_v31 = vpack.c.bf16 %v115_v29, %v108_v27  ;;  %v203_v32 = vld [vmem:[%s4732_s2 + $0x320] sm:$0xff] }
  0x17   :  { %v20_v35 = vld [vmem:[%s4733_s1] sm:$0xff]  ;;  %v22_v37 = vld [vmem:[%s4733_s1 + $0x10] sm:$0xff]  ;;  %v21_v38 = vld [vmem:[%s4733_s1 + $0x8] sm:$0xff] }
  0x18   :  { %2323 = vmatpush1.bf16.msra.mxu0 %v2322_v60  ;;  %2351 = vmatpush1.bf16.msra.mxu1 %v2350_v0  ;;  %v23_v40 = vld [vmem:[%s4733_s1 + $0x18] sm:$0x7f]  ;;  %v107_v62 = vld [vmem:[%s4732_s2 + $0x20] sm:$0xff]  ;;  %v109_v1 = vld [vmem:[%s4732_s2 + $0x30] sm:$0xff] }
  0x19   :  { %2325 = vmatprep.subr.bf16.mxu0 %v2324_v4  ;;  %2353 = vmatprep.subr.bf16.mxu1 %v2352_v10  ;;  %v114_v63 = vld [vmem:[%s4732_s2 + $0x58] sm:$0xff]  ;;  %v73_v0 = vld [vmem:[%s4734_s3] sm:$0xff]  ;;  %v116_v2 = vld [vmem:[%s4732_s2 + $0x68] sm:$0xff] }
  0x1a   :  { %v122_v3 = vld [vmem:[%s4732_s2 + $0x98] sm:$0xff]  ;;  %v129_v4 = vld [vmem:[%s4732_s2 + $0xd0] sm:$0xff]  ;;  %v2362_v6 = vpack.c.bf16 %v114_v63, %v107_v62  ;;  %v74_v10 = vld [vmem:[%s4734_s3 + $0x8] sm:$0xff] }
  0x1b   :  { %v121_v11 = vld [vmem:[%s4732_s2 + $0x90] sm:$0xff]  ;;  %v2364_v12 = vpack.c.bf16 %v129_v4, %v122_v3  ;;  %v128_v13 = vld [vmem:[%s4732_s2 + $0xc8] sm:$0xff]  ;;  %v130_v15 = vld [vmem:[%s4732_s2 + $0xd8] sm:$0xff] }
  0x1c   :  { %2327 = vmatpush1.bf16.msra.mxu0 %v2326_v9  ;;  %2355 = vmatpush1.bf16.msra.mxu1 %v2354_v14  ;;  %v2389_v9 = vpack.c.bf16 %v116_v2, %v109_v1  ;;  %v123_v14 = vld [vmem:[%s4732_s2 + $0xa0] sm:$0xff]  ;;  %v136_v16 = vld [vmem:[%s4732_s2 + $0x108] sm:$0xff]  ;;  %v2366_v20 = vpack.c.bf16 %v128_v13, %v121_v11  ;;  %v142_v24 = vld [vmem:[%s4732_s2 + $0x138] sm:$0xff] }
  0x1d   :  { %2329 = vmatprep.subr.bf16.mxu0 %v2328_v18  ;;  %2357 = vmatprep.subr.bf16.mxu1 %v2356_v23  ;;  %v143_v17 = vld [vmem:[%s4732_s2 + $0x140] sm:$0xff]  ;;  %v2392_v21 = vpack.c.bf16 %v130_v15, %v123_v14  ;;  %v150_v27 = vld [vmem:[%s4732_s2 + $0x178] sm:$0xff] }
  0x1e   :  { %v135_v22 = vld [vmem:[%s4732_s2 + $0x100] sm:$0xff]  ;;  %v2368_v23 = vpack.c.bf16 %v143_v17, %v136_v16  ;;  %v80_v14 = vld [vmem:[%s4734_s3 + $0x38] sm:$0xff]  ;;  %v205_v17 = vld [vmem:[%s4732_s2 + $0x330] sm:$0xff] }
  0x1f   :  { %v199_v62 = vld [vmem:[%s4732_s2 + $0x300] sm:$0xff]  ;;  %v206_v15 = vld [vmem:[%s4732_s2 + $0x338] sm:$0xff] }
  0x20   :  { %2331 = vmatpush1.bf16.msra.mxu0 %v2330_v19  ;;  %2359 = vmatpush1.bf16.msra.mxu1 %v2358_v25  ;;  %v75_v19 = vld [vmem:[%s4734_s3 + $0x10] sm:$0xff]  ;;  %v191_v3 = vld [vmem:[%s4732_s2 + $0x2c0] sm:$0xff] }
  0x21   :  { %281 = vmatprep.subr.mxu0 %v202_v26  ;;  %436 = vmatprep.subr.mxu1 %v204_v28  ;;  %v137_v25 = vld [vmem:[%s4732_s2 + $0x110] sm:$0xff]  ;;  %v144_v26 = vld [vmem:[%s4732_s2 + $0x148] sm:$0xff] }
  0x22   :  { %v157_v28 = vld [vmem:[%s4732_s2 + $0x1b0] sm:$0xff] }
  0x24   :  { %282 = vmatpush1.msra.mxu0 %v201_v30  ;;  %437 = vmatpush1.msra.mxu1 %v203_v32  ;;  %v76_v30 = vld [vmem:[%s4734_s3 + $0x18] sm:$0xff]  ;;  %v2395_v32 = vpack.c.bf16 %v144_v26, %v137_v25 }
  0x25   :  { %2361 = vmatprep.subr.bf16.mxu0 %v2360_v31  ;;  %2388 = vmatprep.subr.bf16.mxu1 %v2474_v33  ;;  %v2370_v31 = vpack.c.bf16 %v142_v24, %v135_v22  ;;  %v84_v25 = vld [vmem:[%s4734_s3 + $0x58] sm:$0xff] }
  0x81   :  { %v41_v34 = vpop.permute.xlu1 %40  ;;  %v31_v36 = vpop.permute.xlu0 %30 }
  0x82   :  { %v48_v39 = vmul.f32 %v31_v36, %v20_v35  ;;  %v50_v43 = vmul.f32 %v41_v34, %v22_v37  ;;  %v149_v34 = vld [vmem:[%s4732_s2 + $0x170] sm:$0xff]  ;;  %v2372_v35 = vpack.c.bf16 %v157_v28, %v150_v27  ;;  %v156_v36 = vld [vmem:[%s4732_s2 + $0x1a8] sm:$0xff]  ;;  %v151_v37 = vld [vmem:[%s4732_s2 + $0x180] sm:$0xff] }
  0x83   :  { %v85_v27 = vld [vmem:[%s4734_s3 + $0x60] sm:$0xff] }
  0x84   :  { %v53_v45 = vsel %vm52_vm0, %v48_v39, 0.0  ;;  %v56_v49 = vsel %vm52_vm0, %v50_v43, 0.0  ;;  %v164_v39 = vld [vmem:[%s4732_s2 + $0x1e8] sm:$0xff]  ;;  %v2374_v43 = vpack.c.bf16 %v156_v36, %v149_v34 }
  0x85   :  { %v46_v41 = vpop.permute.xlu1 %45  ;;  %v36_v42 = vpop.permute.xlu0 %35 }
  0x86   :  { %v49_v44 = vmul.f32 %v36_v42, %v21_v38  ;;  %v51_v46 = vmul.f32 %v46_v41, %v23_v40  ;;  %v158_v38 = vld [vmem:[%s4732_s2 + $0x1b8] sm:$0xff]  ;;  %v171_v40 = vld [vmem:[%s4732_s2 + $0x220] sm:$0xff] }
  0x87   :  { %v77_v42 = vld [vmem:[%s4734_s3 + $0x20] sm:$0xff] }
  0x88   :  { %v54_v47 = vsel %vm52_vm0, %v49_v44, 0.0  ;;  %v59_v51 = vsel %vm58_vm1, %v51_v46, 0.0  ;;  %v2398_v44 = vpack.c.bf16 %v158_v38, %v151_v37  ;;  %v2376_v46 = vpack.c.bf16 %v171_v40, %v164_v39 }
  0x89   :  { %v55_v48 = vadd.f32 %v54_v47, %v53_v45  ;;  %v163_v45 = vld [vmem:[%s4732_s2 + $0x1e0] sm:$0xff]  ;;  %v170_v47 = vld [vmem:[%s4732_s2 + $0x218] sm:$0xff] }
  0x8b   :  { %v57_v50 = vadd.f32 %v56_v49, %v55_v48  ;;  %v165_v48 = vld [vmem:[%s4732_s2 + $0x1f0] sm:$0xff]  ;;  %v172_v49 = vld [vmem:[%s4732_s2 + $0x228] sm:$0xff] }
  0x8d   :  { %v60_v52 = vadd.f32 %v59_v51, %v57_v50  ;;  %v178_v50 = vld [vmem:[%s4732_s2 + $0x258] sm:$0xff]  ;;  %v185_v51 = vld [vmem:[%s4732_s2 + $0x290] sm:$0xff] }
  0x8f   :  { %v61_v53 = vrot.slane %v60_v52, 4 }
  0x91   :  { %v62_v54 = vadd.f32 %v61_v53, %v60_v52  ;;  %v78_v53 = vld [vmem:[%s4734_s3 + $0x28] sm:$0xff] }
  0x93   :  { %v63_v55 = vrot.slane %v62_v54, 2 }
  0x95   :  { %v64_v56 = vadd.f32 %v63_v55, %v62_v54  ;;  %v2378_v54 = vpack.c.bf16 %v170_v47, %v163_v45  ;;  %v2401_v55 = vpack.c.bf16 %v172_v49, %v165_v48 }
  0x97   :  { %v65_v57 = vrot.slane %v64_v56, 1 }
  0x99   :  { %v66_v58 = vadd.f32 %v65_v57, %v64_v56  ;;  %v177_v56 = vld [vmem:[%s4732_s2 + $0x250] sm:$0xff]  ;;  %v2380_v57 = vpack.c.bf16 %v185_v51, %v178_v50 }
  0x9b   :  { %v2138_v59 = vmul.f32 -1.442695, %v66_v58  ;;  %v184_v58 = vld [vmem:[%s4732_s2 + $0x288] sm:$0xff] }
  0x9c   :  { %v2382_v1 = vpack.c.bf16 %v184_v58, %v177_v56 }
  0x9d   :  { %2419 = vpow2.f32 %v2138_v59  ;;  %v179_v59 = vld [vmem:[%s4732_s2 + $0x260] sm:$0xff] }
  0xa7   :  { %v2420_v60 = vpop.eup %2419 }
  0xa8   :  { %v70_v61 = vadd.f32 1.0, %v2420_v60  ;;  %v186_v60 = vld [vmem:[%s4732_s2 + $0x298] sm:$0xff] }
  0xa9   :  { %v2404_v2 = vpack.c.bf16 %v186_v60, %v179_v59 }
  0xaa   :  { %2421 = vrcp.f32 %v70_v61  ;;  %v192_v61 = vld [vmem:[%s4732_s2 + $0x2c8] sm:$0xff] }
  0xab   :  { %v2384_v4 = vpack.c.bf16 %v199_v62, %v192_v61 }
  0xb4   :  { %v2745_v5 = vpop.eup %2421 }
  0xb5   :  { %v2748_v7 = vmul.f32 %v2745_v5, %v73_v0  ;;  %v2778_v18 = vmul.f32 %v2745_v5, %v74_v10  ;;  %v2809_v29 = vmul.f32 %v2745_v5, %v75_v19  ;;  %v2840_v41 = vmul.f32 %v2745_v5, %v76_v30  ;;  %v79_v0 = vld [vmem:[%s4734_s3 + $0x30] sm:$0xff]  ;;  %v200_v10 = vld [vmem:[%s4732_s2 + $0x308] sm:$0xff]  ;;  %v207_v19 = vld [vmem:[%s4732_s2 + $0x340] sm:$0xff] }
  0xb6   :  { %v2871_v52 = vmul.f32 %v2745_v5, %v77_v42  ;;  %v2902_v63 = vmul.f32 %v2745_v5, %v78_v53  ;;  %v2927_v11 = vmul.f32 %v2745_v5, %v79_v0  ;;  %v2943_v16 = vmul.f32 %v2745_v5, %v80_v14  ;;  %v86_v30 = vld [vmem:[%s4734_s3 + $0x68] sm:$0xff] }
  0xb7   :  { %2139 = vmatmul.mubr.msk.f32.vlgmr.msra.gmra.mrb[0].mxu0 %vm52_vm0, %v2748_v7  ;;  %2154 = vmatmul.mubr.msk.f32.vlgmr.msra.gmra.mrb[0].mxu1 %vm52_vm0, %v2748_v7  ;;  %v2998_v26 = vmul.f32 %v2745_v5, %v84_v25  ;;  %v3010_v28 = vmul.f32 %v2745_v5, %v85_v27 }
  0xb8   :  { %2363 = vmatpush1.bf16.msra.mxu0 %v2362_v6  ;;  %323 = vmatprep.mubr.f32.mxu0 %v2473_v8  ;;  %v198_v6 = vld [vmem:[%s4732_s2 + $0x2f8] sm:$0xff] }
  0xb9   :  { %478 = vmatprep.mubr.f32.mxu1 %v2473_v8  ;;  %2390 = vmatpush3.bf16.msra.mxu1 %v2389_v9  ;;  %v193_v9 = vld [vmem:[%s4732_s2 + $0x2d0] sm:$0xff] }
  0xba   :  { %2365 = vmatprep.subr.bf16.mxu0 %v2364_v12  ;;  %2391 = vmatprep.subr.bf16.mxu1 %v2474_v33  ;;  %v2386_v12 = vpack.c.bf16 %v198_v6, %v191_v3  ;;  %v2407_v13 = vpack.c.bf16 %v200_v10, %v193_v9 }
  0xbb   :  { %2140 = vmatmul.mubr.msk.f32.gmra.mrb[2].mxu0 %vm52_vm0, %v2778_v18  ;;  %2155 = vmatmul.mubr.msk.f32.gmra.mrb[2].mxu1 %vm52_vm0, %v2778_v18 }
  0xbc   :  { %329 = vmatprep.mubr.f32.mxu0 %v2473_v8  ;;  %484 = vmatprep.mubr.f32.mxu1 %v2473_v8 }
  0xbd   :  { %2367 = vmatpush1.bf16.msra.mxu0 %v2366_v20  ;;  %2393 = vmatpush3.bf16.msra.mxu1 %v2392_v21  ;;  %v82_v21 = vld [vmem:[%s4734_s3 + $0x48] sm:$0xff] }
  0xbe   :  { %2369 = vmatprep.subr.bf16.mxu0 %v2368_v23  ;;  %2394 = vmatprep.subr.bf16.mxu1 %v2474_v33  ;;  %v2974_v22 = vmul.f32 %v2745_v5, %v82_v21  ;;  %v83_v23 = vld [vmem:[%s4734_s3 + $0x50] sm:$0xff] }
  0xbf   :  { %2141 = vmatmul.mubr.msk.f32.gmra.mrb[4].mxu0 %vm52_vm0, %v2809_v29  ;;  %2156 = vmatmul.mubr.msk.f32.gmra.mrb[4].mxu1 %vm52_vm0, %v2809_v29  ;;  %v2986_v24 = vmul.f32 %v2745_v5, %v83_v23 }
  0xc0   :  { %335 = vmatprep.mubr.f32.mxu0 %v2473_v8  ;;  %490 = vmatprep.mubr.f32.mxu1 %v2473_v8 }
  0xc1   :  { %2371 = vmatpush1.bf16.msra.mxu0 %v2370_v31  ;;  %2396 = vmatpush3.bf16.msra.mxu1 %v2395_v32  ;;  %v3022_v31 = vmul.f32 %v2745_v5, %v86_v30  ;;  %v87_v32 = vld [vmem:[%s4734_s3 + $0x70] sm:$0xff] }
  0xc2   :  { %2373 = vmatprep.subr.bf16.mxu0 %v2372_v35  ;;  %2397 = vmatprep.subr.bf16.mxu1 %v2474_v33  ;;  %v3034_v34 = vmul.f32 %v2745_v5, %v87_v32 }
  0xc3   :  { %2142 = vmatmul.mubr.msk.f32.gmra.mrb[6].mxu0 %vm52_vm0, %v2840_v41  ;;  %2157 = vmatmul.mubr.msk.f32.gmra.mrb[6].mxu1 %vm52_vm0, %v2840_v41 }
  0xc4   :  { %341 = vmatprep.mubr.f32.mxu0 %v2473_v8  ;;  %496 = vmatprep.mubr.f32.mxu1 %v2473_v8 }
  0xc5   :  { %2375 = vmatpush1.bf16.msra.mxu0 %v2374_v43  ;;  %2399 = vmatpush3.bf16.msra.mxu1 %v2398_v44 }
  0xc6   :  { %2377 = vmatprep.subr.bf16.mxu0 %v2376_v46  ;;  %2400 = vmatprep.subr.bf16.mxu1 %v2474_v33 }
  0xc7   :  { %2143 = vmatmul.mubr.msk.f32.gmra.mrb[8].mxu0 %vm52_vm0, %v2871_v52  ;;  %2158 = vmatmul.mubr.msk.f32.gmra.mrb[8].mxu1 %vm52_vm0, %v2871_v52 }
  0xc8   :  { %347 = vmatprep.mubr.f32.mxu0 %v2473_v8  ;;  %502 = vmatprep.mubr.f32.mxu1 %v2473_v8 }
  0xc9   :  { %2379 = vmatpush1.bf16.msra.mxu0 %v2378_v54  ;;  %2402 = vmatpush3.bf16.msra.mxu1 %v2401_v55 }
  0xca   :  { %2381 = vmatprep.subr.bf16.mxu0 %v2380_v57  ;;  %2403 = vmatprep.subr.bf16.mxu1 %v2474_v33 }
  0xcb   :  { %2144 = vmatmul.mubr.msk.f32.gmra.mrb[10].mxu0 %vm52_vm0, %v2902_v63  ;;  %2159 = vmatmul.mubr.msk.f32.gmra.mrb[10].mxu1 %vm52_vm0, %v2902_v63 }
  0xcc   :  { %353 = vmatprep.mubr.f32.mxu0 %v2473_v8  ;;  %508 = vmatprep.mubr.f32.mxu1 %v2473_v8 }
  0xcd   :  { %2383 = vmatpush1.bf16.msra.mxu0 %v2382_v1  ;;  %2405 = vmatpush3.bf16.msra.mxu1 %v2404_v2 }
  0xce   :  { %2385 = vmatprep.subr.bf16.mxu0 %v2384_v4  ;;  %2406 = vmatprep.subr.bf16.mxu1 %v2474_v33  ;;  %v81_v33 = vld [vmem:[%s4734_s3 + $0x40] sm:$0xff] }
  0xcf   :  { %2145 = vmatmul.mubr.msk.f32.gmra.mrb[12].mxu0 %vm52_vm0, %v2927_v11  ;;  %2160 = vmatmul.mubr.msk.f32.gmra.mrb[12].mxu1 %vm52_vm0, %v2927_v11  ;;  %v2962_v20 = vmul.f32 %v2745_v5, %v81_v33 }
  0xd0   :  { %359 = vmatprep.mubr.f32.mxu0 %v2473_v8  ;;  %514 = vmatprep.mubr.f32.mxu1 %v2473_v8 }
  0xd1   :  { %2387 = vmatpush1.bf16.msra.mxu0 %v2386_v12  ;;  %2408 = vmatpush3.bf16.msra.mxu1 %v2407_v13 }
  0xd2   :  { %591 = vmatprep.subr.mxu0 %v206_v15  ;;  %2257 = vmatprep.subr.mxu1 %v2473_v8 }
  0xd3   :  { %2146 = vmatmul.mubr.msk.f32.gmra.mrb[14].mxu0 %vm52_vm0, %v2943_v16  ;;  %2161 = vmatmul.mubr.msk.f32.gmra.mrb[14].mxu1 %vm52_vm0, %v2943_v16 }
  0xd4   :  { %365 = vmatprep.mubr.f32.mxu0 %v2473_v8  ;;  %520 = vmatprep.mubr.f32.mxu1 %v2473_v8 }
  0xd5   :  { %592 = vmatpush1.msra.mxu0 %v205_v17  ;;  %2258 = vmatpush3.msra.mxu1 %v207_v19 }
  0xd7   :  { %2147 = vmatmul.mubr.msk.f32.gmra.mrb[16].mxu0 %vm52_vm0, %v2962_v20  ;;  %2162 = vmatmul.mubr.msk.f32.gmra.mrb[16].mxu1 %vm52_vm0, %v2962_v20 }
  0xd8   :  { %371 = vmatprep.mubr.f32.mxu0 %v2473_v8  ;;  %526 = vmatprep.mubr.f32.mxu1 %v2473_v8 }
  0xdb   :  { %2148 = vmatmul.mubr.msk.f32.gmra.mrb[18].mxu0 %vm52_vm0, %v2974_v22  ;;  %2163 = vmatmul.mubr.msk.f32.gmra.mrb[18].mxu1 %vm52_vm0, %v2974_v22 }
  0xdc   :  { %377 = vmatprep.mubr.f32.mxu0 %v2473_v8  ;;  %532 = vmatprep.mubr.f32.mxu1 %v2473_v8 }
  0xdf   :  { %2149 = vmatmul.mubr.msk.f32.gmra.mrb[20].mxu0 %vm52_vm0, %v2986_v24  ;;  %2164 = vmatmul.mubr.msk.f32.gmra.mrb[20].mxu1 %vm52_vm0, %v2986_v24 }
  0xe0   :  { %383 = vmatprep.mubr.f32.mxu0 %v2473_v8  ;;  %538 = vmatprep.mubr.f32.mxu1 %v2473_v8 }
  0xe3   :  { %2150 = vmatmul.mubr.msk.f32.gmra.mrb[22].mxu0 %vm52_vm0, %v2998_v26  ;;  %2165 = vmatmul.mubr.msk.f32.gmra.mrb[22].mxu1 %vm52_vm0, %v2998_v26 }
  0xe4   :  { %389 = vmatprep.mubr.f32.mxu0 %v2473_v8  ;;  %544 = vmatprep.mubr.f32.mxu1 %v2473_v8 }
  0xe7   :  { %2151 = vmatmul.mubr.msk.f32.gmra.mrb[24].mxu0 %vm52_vm0, %v3010_v28  ;;  %2166 = vmatmul.mubr.msk.f32.gmra.mrb[24].mxu1 %vm52_vm0, %v3010_v28 }
  0xe8   :  { %395 = vmatprep.mubr.f32.mxu0 %v2473_v8  ;;  %550 = vmatprep.mubr.f32.mxu1 %v2473_v8 }
  0xeb   :  { %2152 = vmatmul.mubr.msk.f32.gmra.mrb[26].mxu0 %vm52_vm0, %v3022_v31  ;;  %2167 = vmatmul.mubr.msk.f32.gmra.mrb[26].mxu1 %vm52_vm0, %v3022_v31 }
  0xec   :  { %401 = vmatprep.mubr.f32.mxu0 %v2473_v8  ;;  %556 = vmatprep.mubr.f32.mxu1 %v2473_v8 }
  0xef   :  { %2153 = vmatmul.mubr.msk.f32.gmra.mrb[28].mxu0 %vm52_vm0, %v3034_v34  ;;  %2168 = vmatmul.mubr.msk.f32.gmra.mrb[28].mxu1 %vm52_vm0, %v3034_v34 }
  0xf0   :  { %627 = vmatprep.mubr.f32.mxu0 %v2473_v8  ;;  %2259 = vmatprep.mubr.msk.f32.mxu1 %vm2475_vm2, %v2473_v8 }
  0xf3   :  { %2169 = vmatmul.mubr.msk.f32.vlgmr.msra.gmra.mrb[30].mxu0 %vm52_vm0, %v2748_v7  ;;  %2260 = vmatmul.mubr.msk.f32.vlgmr.msra.gmra.mrb[30].mxu1 %vm52_vm0, %v2748_v7 }
  0xf4   :  { %633 = vmatprep.mubr.f32.mxu0 %v2473_v8  ;;  %2262 = vmatprep.mubr.msk.f32.mxu1 %vm2475_vm2, %v2473_v8 }
  0xf7   :  { %2170 = vmatmul.mubr.msk.f32.gmra.mrb[32].mxu0 %vm52_vm0, %v2778_v18  ;;  %2263 = vmatmul.mubr.msk.f32.gmra.mrb[32].mxu1 %vm52_vm0, %v2778_v18 }
  0xf8   :  { %639 = vmatprep.mubr.f32.mxu0 %v2473_v8  ;;  %2265 = vmatprep.mubr.msk.f32.mxu1 %vm2475_vm2, %v2473_v8 }
  0xfb   :  { %2171 = vmatmul.mubr.msk.f32.gmra.mrb[34].mxu0 %vm52_vm0, %v2809_v29  ;;  %2266 = vmatmul.mubr.msk.f32.gmra.mrb[34].mxu1 %vm52_vm0, %v2809_v29 }
  0xfc   :  { %645 = vmatprep.mubr.f32.mxu0 %v2473_v8  ;;  %2268 = vmatprep.mubr.msk.f32.mxu1 %vm2475_vm2, %v2473_v8 }
  0xff   :  { %2172 = vmatmul.mubr.msk.f32.gmra.mrb[36].mxu0 %vm52_vm0, %v2840_v41  ;;  %2269 = vmatmul.mubr.msk.f32.gmra.mrb[36].mxu1 %vm52_vm0, %v2840_v41 }
 0x100   :  { %651 = vmatprep.mubr.f32.mxu0 %v2473_v8  ;;  %2271 = vmatprep.mubr.msk.f32.mxu1 %vm2475_vm2, %v2473_v8 }
 0x103   :  { %2173 = vmatmul.mubr.msk.f32.gmra.mrb[38].mxu0 %vm52_vm0, %v2871_v52  ;;  %2272 = vmatmul.mubr.msk.f32.gmra.mrb[38].mxu1 %vm52_vm0, %v2871_v52 }
 0x104   :  { %657 = vmatprep.mubr.f32.mxu0 %v2473_v8  ;;  %2274 = vmatprep.mubr.msk.f32.mxu1 %vm2475_vm2, %v2473_v8 }
 0x107   :  { %2174 = vmatmul.mubr.msk.f32.gmra.mrb[40].mxu0 %vm52_vm0, %v2902_v63  ;;  %2275 = vmatmul.mubr.msk.f32.gmra.mrb[40].mxu1 %vm52_vm0, %v2902_v63 }
 0x108   :  { %663 = vmatprep.mubr.f32.mxu0 %v2473_v8  ;;  %2277 = vmatprep.mubr.msk.f32.mxu1 %vm2475_vm2, %v2473_v8 }
 0x10b   :  { %2175 = vmatmul.mubr.msk.f32.gmra.mrb[42].mxu0 %vm52_vm0, %v2927_v11  ;;  %2278 = vmatmul.mubr.msk.f32.gmra.mrb[42].mxu1 %vm52_vm0, %v2927_v11 }
 0x10c   :  { %669 = vmatprep.mubr.f32.mxu0 %v2473_v8  ;;  %2280 = vmatprep.mubr.msk.f32.mxu1 %vm2475_vm2, %v2473_v8 }
 0x10f   :  { %2176 = vmatmul.mubr.msk.f32.gmra.mrb[44].mxu0 %vm52_vm0, %v2943_v16  ;;  %2281 = vmatmul.mubr.msk.f32.gmra.mrb[44].mxu1 %vm52_vm0, %v2943_v16 }
 0x110   :  { %675 = vmatprep.mubr.f32.mxu0 %v2473_v8  ;;  %2283 = vmatprep.mubr.msk.f32.mxu1 %vm2475_vm2, %v2473_v8 }
 0x113   :  { %2177 = vmatmul.mubr.msk.f32.gmra.mrb[46].mxu0 %vm52_vm0, %v2962_v20  ;;  %2284 = vmatmul.mubr.msk.f32.gmra.mrb[46].mxu1 %vm52_vm0, %v2962_v20 }
 0x114   :  { %681 = vmatprep.mubr.f32.mxu0 %v2473_v8  ;;  %2286 = vmatprep.mubr.msk.f32.mxu1 %vm2475_vm2, %v2473_v8 }
 0x117   :  { %2178 = vmatmul.mubr.msk.f32.gmra.mrb[48].mxu0 %vm52_vm0, %v2974_v22  ;;  %2287 = vmatmul.mubr.msk.f32.gmra.mrb[48].mxu1 %vm52_vm0, %v2974_v22 }
 0x118   :  { %687 = vmatprep.mubr.f32.mxu0 %v2473_v8  ;;  %2289 = vmatprep.mubr.msk.f32.mxu1 %vm2475_vm2, %v2473_v8 }
 0x11b   :  { %2179 = vmatmul.mubr.msk.f32.gmra.mrb[50].mxu0 %vm52_vm0, %v2986_v24  ;;  %2290 = vmatmul.mubr.msk.f32.gmra.mrb[50].mxu1 %vm52_vm0, %v2986_v24 }
 0x11c   :  { %693 = vmatprep.mubr.f32.mxu0 %v2473_v8  ;;  %2292 = vmatprep.mubr.msk.f32.mxu1 %vm2475_vm2, %v2473_v8 }
 0x11f   :  { %2180 = vmatmul.mubr.msk.f32.gmra.mrb[52].mxu0 %vm52_vm0, %v2998_v26  ;;  %2293 = vmatmul.mubr.msk.f32.gmra.mrb[52].mxu1 %vm52_vm0, %v2998_v26 }
 0x120   :  { %699 = vmatprep.mubr.f32.mxu0 %v2473_v8  ;;  %2295 = vmatprep.mubr.msk.f32.mxu1 %vm2475_vm2, %v2473_v8 }
 0x123   :  { %2181 = vmatmul.mubr.msk.f32.gmra.mrb[54].mxu0 %vm52_vm0, %v3010_v28  ;;  %2296 = vmatmul.mubr.msk.f32.gmra.mrb[54].mxu1 %vm52_vm0, %v3010_v28 }
 0x124   :  { %705 = vmatprep.mubr.f32.mxu0 %v2473_v8  ;;  %2298 = vmatprep.mubr.msk.f32.mxu1 %vm2475_vm2, %v2473_v8 }
 0x127   :  { %2182 = vmatmul.mubr.msk.f32.gmra.mrb[56].mxu0 %vm52_vm0, %v3022_v31  ;;  %2299 = vmatmul.mubr.msk.f32.gmra.mrb[56].mxu1 %vm52_vm0, %v3022_v31 }
 0x128   :  { %711 = vmatprep.mubr.f32.mxu0 %v2473_v8  ;;  %2301 = vmatprep.mubr.msk.f32.mxu1 %vm2475_vm2, %v2473_v8 }
 0x12b   :  { %2183 = vmatmul.mubr.msk.f32.gmra.mrb[58].mxu0 %vm52_vm0, %v3034_v34  ;;  %2302 = vmatmul.mubr.msk.f32.gmra.mrb[58].mxu1 %vm52_vm0, %v3034_v34 }
 0x18a   :  { %v3145_v5 = vpop.f32.mrb[0].mxu0  ;;  %v3147_v7 = vpop.f32.mrb[0].mxu1 }
 0x18b   :  { %v3149_v18 = vpop.f32.mrb[1].mxu0  ;;  %v3151_v29 = vpop.f32.mrb[1].mxu1  ;;  %v1204_v35 = vmul.f32 %v3145_v5, %v3145_v5  ;;  %v1206_v40 = vmul.f32 %v3147_v7, %v3147_v7 }
 0x18c   :  { %v1069_v8 = vadd.f32 %v3149_v18, %v3145_v5  ;;  %v1205_v36 = vmul.f32 %v3149_v18, %v3149_v18  ;;  %v1207_v44 = vmul.f32 %v3151_v29, %v3151_v29 }
 0x18e   :  { %v3159_v37 = vpop.f32.mrb[2].mxu0  ;;  %v3161_v38 = vpop.f32.mrb[2].mxu1  ;;  %v1070_v39 = vadd.f32 %v1069_v8, %v3147_v7  ;;  %v1309_v41 = vadd.f32 %v1205_v36, %v1204_v35 }
 0x18f   :  { %v3166_v42 = vpop.f32.mrb[3].mxu0  ;;  %v3168_v43 = vpop.f32.mrb[3].mxu1  ;;  %v1211_v45 = vmul.f32 %v3159_v37, %v3159_v37  ;;  %v1213_v54 = vmul.f32 %v3161_v38, %v3161_v38 }
 0x190   :  { %v3175_v46 = vadd.f32 %v1070_v39, %v3151_v29  ;;  %v1310_v47 = vadd.f32 %v1309_v41, %v1206_v40  ;;  %v1078_v48 = vadd.f32 %v3166_v42, %v3159_v37  ;;  %v1212_v49 = vmul.f32 %v3166_v42, %v3166_v42 }
 0x191   :  { %v1214_v58 = vmul.f32 %v3168_v43, %v3168_v43 }
 0x192   :  { %v3181_v50 = vpop.f32.mrb[4].mxu0  ;;  %v3183_v51 = vpop.f32.mrb[4].mxu1  ;;  %v3185_v52 = vadd.f32 %v1310_v47, %v1207_v44  ;;  %v1079_v53 = vadd.f32 %v1078_v48, %v3161_v38  ;;  %v1318_v55 = vadd.f32 %v1212_v49, %v1211_v45 }
 0x193   :  { %v3190_v56 = vpop.f32.mrb[5].mxu0  ;;  %v3192_v57 = vpop.f32.mrb[5].mxu1  ;;  %v1218_v59 = vmul.f32 %v3181_v50, %v3181_v50  ;;  %v1220_v4 = vmul.f32 %v3183_v51, %v3183_v51 }
 0x194   :  { %v3199_v60 = vadd.f32 %v1079_v53, %v3168_v43  ;;  %v1319_v61 = vadd.f32 %v1318_v55, %v1213_v54  ;;  %v1087_v62 = vadd.f32 %v3190_v56, %v3181_v50  ;;  %v1219_v63 = vmul.f32 %v3190_v56, %v3190_v56 }
 0x195   :  { %v1221_v13 = vmul.f32 %v3192_v57, %v3192_v57 }
 0x196   :  { %v3205_v0 = vpop.f32.mrb[6].mxu0  ;;  %v3207_v1 = vpop.f32.mrb[6].mxu1  ;;  %v3209_v2 = vadd.f32 %v1319_v61, %v1214_v58  ;;  %v1088_v3 = vadd.f32 %v1087_v62, %v3183_v51  ;;  %v1327_v6 = vadd.f32 %v1219_v63, %v1218_v59 }
 0x197   :  { %4800 = vst [vmem:[#allocation2_spill] sm:$0xff] %v3207_v1  ;;  %v3214_v9 = vpop.f32.mrb[7].mxu0  ;;  %v3216_v10 = vpop.f32.mrb[7].mxu1  ;;  %v1225_v11 = vmul.f32 %v3205_v0, %v3205_v0  ;;  %v1227_v20 = vmul.f32 %v3207_v1, %v3207_v1 }
 0x198   :  { %4801 = vst [vmem:[#allocation3_spill] sm:$0xff] %v3216_v10  ;;  %v3221_v12 = vadd.f32 %v1088_v3, %v3192_v57  ;;  %v1328_v14 = vadd.f32 %v1327_v6, %v1220_v4  ;;  %v1226_v15 = vmul.f32 %v3214_v9, %v3214_v9  ;;  %v1096_v16 = vadd.f32 %v3214_v9, %v3205_v0 }
 0x199   :  { %v1228_v26 = vmul.f32 %v3216_v10, %v3216_v10 }
 0x19a   :  { %v3229_v33 = vpop.f32.mrb[8].mxu0  ;;  %v3231_v17 = vpop.f32.mrb[8].mxu1  ;;  %v3233_v19 = vadd.f32 %v1328_v14, %v1221_v13  ;;  %v1336_v21 = vadd.f32 %v1226_v15, %v1225_v11  ;;  %v1097_v24 = vadd.f32 %v1096_v16, %v3207_v1 }
 0x19b   :  { %4802 = vst [vmem:[#allocation4_spill] sm:$0xff] %v3229_v33  ;;  %4803 = vst [vmem:[#allocation5_spill] sm:$0xff] %v3231_v17  ;;  %v3237_v22 = vpop.f32.mrb[9].mxu0  ;;  %v3239_v23 = vpop.f32.mrb[9].mxu1  ;;  %v1232_v25 = vmul.f32 %v3229_v33, %v3229_v33  ;;  %v1234_v36 = vmul.f32 %v3231_v17, %v3231_v17 }
 0x19c   :  { %4804 = vst [vmem:[#allocation6_spill] sm:$0xff] %v3237_v22  ;;  %4805 = vst [vmem:[#allocation7_spill] sm:$0xff] %v3239_v23  ;;  %v1337_v27 = vadd.f32 %v1336_v21, %v1227_v20  ;;  %v1105_v28 = vadd.f32 %v3237_v22, %v3229_v33  ;;  %v1233_v30 = vmul.f32 %v3237_v22, %v3237_v22 }
 0x19d   :  { %v3251_v31 = vadd.f32 %v1097_v24, %v3216_v10  ;;  %v1235_v47 = vmul.f32 %v3239_v23, %v3239_v23 }
 0x19e   :  { %v3253_v32 = vpop.f32.mrb[10].mxu0  ;;  %v3255_v34 = vpop.f32.mrb[10].mxu1  ;;  %v3257_v35 = vadd.f32 %v1337_v27, %v1228_v26  ;;  %v1106_v8 = vadd.f32 %v1105_v28, %v3231_v17  ;;  %v1345_v39 = vadd.f32 %v1233_v30, %v1232_v25 }
 0x19f   :  { %4806 = vst [vmem:[#allocation8_spill] sm:$0xff] %v3253_v32  ;;  %4807 = vst [vmem:[#allocation9_spill] sm:$0xff] %v3255_v34  ;;  %v3262_v40 = vpop.f32.mrb[11].mxu0  ;;  %v3264_v41 = vpop.f32.mrb[11].mxu1  ;;  %v1239_v44 = vmul.f32 %v3253_v32, %v3253_v32  ;;  %v1241_v59 = vmul.f32 %v3255_v34, %v3255_v34 }
 0x1a0   :  { %4808 = vst [vmem:[#allocation10_spill] sm:$0xff] %v3262_v40  ;;  %4809 = vst [vmem:[#allocation11_spill] sm:$0xff] %v3264_v41  ;;  %v3269_v45 = vadd.f32 %v1106_v8, %v3239_v23  ;;  %v1346_v48 = vadd.f32 %v1345_v39, %v1234_v36  ;;  %v1240_v49 = vmul.f32 %v3262_v40, %v3262_v40 }
 0x1a1   :  { %v1114_v53 = vadd.f32 %v3262_v40, %v3253_v32  ;;  %v1242_v6 = vmul.f32 %v3264_v41, %v3264_v41 }
 0x1a2   :  { %v3277_v54 = vpop.f32.mrb[12].mxu0  ;;  %v3279_v55 = vpop.f32.mrb[12].mxu1  ;;  %v3281_v58 = vadd.f32 %v1346_v48, %v1235_v47  ;;  %v1354_v61 = vadd.f32 %v1240_v49, %v1239_v44 }
 0x1a3   :  { %4810 = vst [vmem:[#allocation12_spill] sm:$0xff] %v3277_v54  ;;  %4811 = vst [vmem:[#allocation13_spill] sm:$0xff] %v3279_v55  ;;  %v3285_v62 = vpop.f32.mrb[13].mxu0  ;;  %v3287_v63 = vpop.f32.mrb[13].mxu1  ;;  %v1115_v3 = vadd.f32 %v1114_v53, %v3255_v34  ;;  %v1246_v4 = vmul.f32 %v3277_v54, %v3277_v54  ;;  %v1248_v25 = vmul.f32 %v3279_v55, %v3279_v55 }
 0x1a4   :  { %4812 = vst [vmem:[#allocation14_spill] sm:$0xff] %v3285_v62  ;;  %4813 = vst [vmem:[#allocation15_spill] sm:$0xff] %v3287_v63  ;;  %v1355_v11 = vadd.f32 %v1354_v61, %v1241_v59  ;;  %v1123_v13 = vadd.f32 %v3285_v62, %v3277_v54  ;;  %v1247_v14 = vmul.f32 %v3285_v62, %v3285_v62 }
 0x1a5   :  { %v3299_v15 = vadd.f32 %v1115_v3, %v3264_v41  ;;  %v1249_v36 = vmul.f32 %v3287_v63, %v3287_v63 }
 0x1a6   :  { %v3301_v16 = vpop.f32.mrb[14].mxu0  ;;  %v3303_v20 = vpop.f32.mrb[14].mxu1  ;;  %v3305_v21 = vadd.f32 %v1355_v11, %v1242_v6  ;;  %v1124_v24 = vadd.f32 %v1123_v13, %v3279_v55  ;;  %v1363_v26 = vadd.f32 %v1247_v14, %v1246_v4 }
 0x1a7   :  { %4814 = vst [vmem:[#allocation16_spill] sm:$0xff] %v3301_v16  ;;  %4815 = vst [vmem:[#allocation17_spill] sm:$0xff] %v3303_v20  ;;  %v3310_v27 = vpop.f32.mrb[15].mxu0  ;;  %v3312_v28 = vpop.f32.mrb[15].mxu1  ;;  %v1253_v30 = vmul.f32 %v3301_v16, %v3301_v16  ;;  %v1255_v59 = vmul.f32 %v3303_v20, %v3303_v20 }
 0x1a8   :  { %4816 = vst [vmem:[#allocation18_spill] sm:$0xff] %v3310_v27  ;;  %4817 = vst [vmem:[#allocation19_spill] sm:$0xff] %v3312_v28  ;;  %v3317_v8 = vadd.f32 %v1124_v24, %v3287_v63  ;;  %v1364_v39 = vadd.f32 %v1363_v26, %v1248_v25  ;;  %v1254_v44 = vmul.f32 %v3310_v27, %v3310_v27 }
 0x1a9   :  { %v1132_v47 = vadd.f32 %v3310_v27, %v3301_v16  ;;  %v1256_v13 = vmul.f32 %v3312_v28, %v3312_v28 }
 0x1aa   :  { %v3325_v48 = vpop.f32.mrb[16].mxu0  ;;  %v3327_v49 = vpop.f32.mrb[16].mxu1  ;;  %v3329_v53 = vadd.f32 %v1364_v39, %v1249_v36  ;;  %v1372_v61 = vadd.f32 %v1254_v44, %v1253_v30 }
 0x1ab   :  { %4818 = vst [vmem:[#allocation20_spill] sm:$0xff] %v3325_v48  ;;  %4819 = vst [vmem:[#allocation21_spill] sm:$0xff] %v3327_v49  ;;  %v3333_v3 = vpop.f32.mrb[17].mxu0  ;;  %v3335_v4 = vpop.f32.mrb[17].mxu1  ;;  %v1133_v6 = vadd.f32 %v1132_v47, %v3303_v20  ;;  %v1260_v11 = vmul.f32 %v3325_v48, %v3325_v48  ;;  %v1262_v47 = vmul.f32 %v3327_v49, %v3327_v49 }
 0x1ac   :  { %4820 = vst [vmem:[#allocation22_spill] sm:$0xff] %v3333_v3  ;;  %4821 = vst [vmem:[#allocation23_spill] sm:$0xff] %v3335_v4  ;;  %v1373_v14 = vadd.f32 %v1372_v61, %v1255_v59  ;;  %v1141_v24 = vadd.f32 %v3333_v3, %v3325_v48  ;;  %v1261_v25 = vmul.f32 %v3333_v3, %v3333_v3 }
 0x1ad   :  { %v3347_v26 = vadd.f32 %v1133_v6, %v3312_v28 }
 0x1ae   :  { %v3349_v30 = vpop.f32.mrb[18].mxu0  ;;  %v3351_v36 = vpop.f32.mrb[18].mxu1  ;;  %v3353_v39 = vadd.f32 %v1373_v14, %v1256_v13  ;;  %v1142_v44 = vadd.f32 %v1141_v24, %v3327_v49  ;;  %v1381_v59 = vadd.f32 %v1261_v25, %v1260_v11  ;;  %v1263_v13 = vmul.f32 %v3335_v4, %v3335_v4 }
 0x1af   :  { %4822 = vst [vmem:[#allocation24_spill] sm:$0xff] %v3349_v30  ;;  %4823 = vst [vmem:[#allocation25_spill] sm:$0xff] %v3351_v36  ;;  %v3358_v61 = vpop.f32.mrb[19].mxu0  ;;  %v3360_v48 = vpop.f32.mrb[19].mxu1  ;;  %v1267_v6 = vmul.f32 %v3349_v30, %v3349_v30 }
 0x1b0   :  { %4824 = vst [vmem:[#allocation26_spill] sm:$0xff] %v3358_v61  ;;  %4825 = vst [vmem:[#allocation27_spill] sm:$0xff] %v3360_v48  ;;  %v3365_v3 = vadd.f32 %v1142_v44, %v3335_v4  ;;  %v1382_v14 = vadd.f32 %v1381_v59, %v1262_v47  ;;  %v1268_v24 = vmul.f32 %v3358_v61, %v3358_v61 }
 0x1b1   :  { %v1150_v11 = vadd.f32 %v3358_v61, %v3349_v30  ;;  %v1269_v44 = vmul.f32 %v3351_v36, %v3351_v36  ;;  %v1270_v61 = vmul.f32 %v3360_v48, %v3360_v48 }
 0x1b2   :  { %v3373_v25 = vpop.f32.mrb[20].mxu0  ;;  %v3375_v49 = vpop.f32.mrb[20].mxu1  ;;  %v3377_v28 = vadd.f32 %v1382_v14, %v1263_v13  ;;  %v1390_v20 = vadd.f32 %v1268_v24, %v1267_v6 }
 0x1b3   :  { %4826 = vst [vmem:[#allocation28_spill] sm:$0xff] %v3373_v25  ;;  %4827 = vst [vmem:[#allocation29_spill] sm:$0xff] %v3375_v49  ;;  %v3381_v27 = vpop.f32.mrb[21].mxu0  ;;  %v3383_v4 = vpop.f32.mrb[21].mxu1  ;;  %v1151_v47 = vadd.f32 %v1150_v11, %v3351_v36  ;;  %v1274_v59 = vmul.f32 %v3373_v25, %v3373_v25 }
 0x1b4   :  { %4828 = vst [vmem:[#allocation30_spill] sm:$0xff] %v3381_v27  ;;  %4829 = vst [vmem:[#allocation31_spill] sm:$0xff] %v3383_v4  ;;  %v1391_v30 = vadd.f32 %v1390_v20, %v1269_v44  ;;  %v1159_v13 = vadd.f32 %v3381_v27, %v3373_v25  ;;  %v1275_v14 = vmul.f32 %v3381_v27, %v3381_v27 }
 0x1b5   :  { %v3395_v6 = vadd.f32 %v1151_v47, %v3360_v48  ;;  %v1276_v20 = vmul.f32 %v3375_v49, %v3375_v49 }
 0x1b6   :  { %v3397_v24 = vpop.f32.mrb[22].mxu0  ;;  %v3399_v16 = vpop.f32.mrb[22].mxu1  ;;  %v3401_v11 = vadd.f32 %v1391_v30, %v1270_v61  ;;  %v1160_v36 = vadd.f32 %v1159_v13, %v3375_v49  ;;  %v1399_v44 = vadd.f32 %v1275_v14, %v1274_v59  ;;  %v1277_v30 = vmul.f32 %v3383_v4, %v3383_v4 }
 0x1b7   :  { %4830 = vst [vmem:[#allocation32_spill] sm:$0xff] %v3397_v24  ;;  %4831 = vst [vmem:[#allocation33_spill] sm:$0xff] %v3399_v16  ;;  %v3406_v63 = vpop.f32.mrb[23].mxu0  ;;  %v3408_v25 = vpop.f32.mrb[23].mxu1  ;;  %v1281_v47 = vmul.f32 %v3397_v24, %v3397_v24 }
 0x1b8   :  { %4832 = vst [vmem:[#allocation34_spill] sm:$0xff] %v3406_v63  ;;  %4833 = vst [vmem:[#allocation35_spill] sm:$0xff] %v3408_v25  ;;  %v3413_v27 = vadd.f32 %v1160_v36, %v3383_v4  ;;  %v1400_v61 = vadd.f32 %v1399_v44, %v1276_v20  ;;  %v1282_v13 = vmul.f32 %v3406_v63, %v3406_v63 }
 0x1b9   :  { %v1168_v59 = vadd.f32 %v3406_v63, %v3397_v24  ;;  %v1283_v36 = vmul.f32 %v3399_v16, %v3399_v16  ;;  %v1284_v63 = vmul.f32 %v3408_v25, %v3408_v25 }
 0x1ba   :  { %v3421_v14 = vpop.f32.mrb[24].mxu0  ;;  %v3423_v49 = vpop.f32.mrb[24].mxu1  ;;  %v3425_v48 = vadd.f32 %v1400_v61, %v1277_v30  ;;  %v1408_v55 = vadd.f32 %v1282_v13, %v1281_v47 }
 0x1bb   :  { %4834 = vst [vmem:[#allocation36_spill] sm:$0xff] %v3421_v14  ;;  %4835 = vst [vmem:[#allocation37_spill] sm:$0xff] %v3423_v49  ;;  %v3429_v62 = vpop.f32.mrb[25].mxu0  ;;  %v3431_v4 = vpop.f32.mrb[25].mxu1  ;;  %v1169_v20 = vadd.f32 %v1168_v59, %v3399_v16  ;;  %v1288_v44 = vmul.f32 %v3421_v14, %v3421_v14 }
 0x1bc   :  { %4836 = vst [vmem:[#allocation38_spill] sm:$0xff] %v3429_v62  ;;  %4837 = vst [vmem:[#allocation39_spill] sm:$0xff] %v3431_v4  ;;  %v1409_v24 = vadd.f32 %v1408_v55, %v1283_v36  ;;  %v1177_v30 = vadd.f32 %v3429_v62, %v3421_v14  ;;  %v1289_v61 = vmul.f32 %v3429_v62, %v3429_v62 }
 0x1bd   :  { %v3443_v47 = vadd.f32 %v1169_v20, %v3408_v25  ;;  %v1290_v55 = vmul.f32 %v3423_v49, %v3423_v49  ;;  %v1291_v20 = vmul.f32 %v3431_v4, %v3431_v4 }
 0x1be   :  { %v3445_v13 = vpop.f32.mrb[26].mxu0  ;;  %v3447_v54 = vpop.f32.mrb[26].mxu1  ;;  %v3449_v59 = vadd.f32 %v1409_v24, %v1284_v63  ;;  %v1178_v16 = vadd.f32 %v1177_v30, %v3423_v49  ;;  %v1417_v36 = vadd.f32 %v1289_v61, %v1288_v44 }
 0x1bf   :  { %4838 = vst [vmem:[#allocation40_spill] sm:$0xff] %v3445_v13  ;;  %4839 = vst [vmem:[#allocation41_spill] sm:$0xff] %v3447_v54  ;;  %v3454_v41 = vpop.f32.mrb[27].mxu0  ;;  %v3456_v14 = vpop.f32.mrb[27].mxu1  ;;  %v1295_v62 = vmul.f32 %v3445_v13, %v3445_v13  ;;  %v1297_v40 = vmul.f32 %v3447_v54, %v3447_v54 }
 0x1c0   :  { %4840 = vst [vmem:[#allocation42_spill] sm:$0xff] %v3454_v41  ;;  %4841 = vst [vmem:[#allocation43_spill] sm:$0xff] %v3456_v14  ;;  %v3463_v25 = vadd.f32 %v1178_v16, %v3431_v4  ;;  %v1418_v63 = vadd.f32 %v1417_v36, %v1290_v55  ;;  %v1186_v24 = vadd.f32 %v3454_v41, %v3445_v13 }
 0x1c1   :  { %v1296_v44 = vmul.f32 %v3454_v41, %v3454_v41  ;;  %v1298_v36 = vmul.f32 %v3456_v14, %v3456_v14 }
 0x1c2   :  { %v403_v30 = vpop.f32.mrb[28].mxu0  ;;  %v558_v61 = vpop.f32.mrb[28].mxu1  ;;  %v3469_v49 = vadd.f32 %v1418_v63, %v1291_v20  ;;  %v1187_v34 = vadd.f32 %v1186_v24, %v3447_v54 }
 0x1c3   :  { %v1426_v32 = vadd.f32 %v1296_v44, %v1295_v62  ;;  %957 = vst [vmem:[%s4735_s5 + $0x310] sm:$0xff] %v403_v30  ;;  %959 = vst [vmem:[%s4735_s5 + $0x320] sm:$0xff] %v558_v61  ;;  %v405_v16 = vpop.f32.mrb[29].mxu0  ;;  %v560_v55 = vpop.f32.mrb[29].mxu1 }
 0x1c4   :  { %958 = vst [vmem:[%s4735_s5 + $0x318] sm:$0xff] %v405_v16  ;;  %960 = vst [vmem:[%s4735_s5 + $0x328] sm:$0xff] %v560_v55  ;;  %v3487_v62 = vadd.f32 %v1187_v34, %v3456_v14 }
 0x1c5   :  { %v1427_v20 = vadd.f32 %v1426_v32, %v1297_v40 }
 0x1c6   :  { %v3491_v63 = vpop.f32.mrb[30].mxu0  ;;  %v784_v24 = vpop.f32.mrb[30].mxu1 }
 0x1c7   :  { %v3493_v44 = vadd.f32 %v1427_v20, %v1298_v36  ;;  %865 = vst.msk [vmem:[%s4735_s5 + $0x30] sm:$0xff] %vm864_vm3, %v784_v24  ;;  %v3499_v30 = vpop.f32.mrb[31].mxu0  ;;  %v2261_v61 = vpop.f32.mrb[31].mxu1  ;;  %v1072_v34 = vadd.f32 %v3175_v46, %v3491_v63  ;;  %v1208_v16 = vmul.f32 %v3491_v63, %v3491_v63 }
 0x1c8   :  { %v1209_v32 = vmul.f32 %v3499_v30, %v3499_v30 }
 0x1c9   :  { %v1073_v40 = vadd.f32 %v1072_v34, %v3499_v30  ;;  %v1312_v55 = vadd.f32 %v3185_v52, %v1208_v16 }
 0x1ca   :  { %v3509_v36 = vpop.f32.mrb[32].mxu0  ;;  %v789_v20 = vpop.f32.mrb[32].mxu1 }
 0x1cb   :  { %872 = vst.msk [vmem:[%s4735_s5 + $0x68] sm:$0xff] %vm864_vm3, %v789_v20  ;;  %v3515_v24 = vpop.f32.mrb[33].mxu0  ;;  %v2264_v46 = vpop.f32.mrb[33].mxu1  ;;  %v1313_v61 = vadd.f32 %v1312_v55, %v1209_v32  ;;  %v1081_v14 = vadd.f32 %v3199_v60, %v3509_v36  ;;  %v1215_v34 = vmul.f32 %v3509_v36, %v3509_v36 }
 0x1cc   :  { %v1216_v52 = vmul.f32 %v3515_v24, %v3515_v24 }
 0x1cd   :  { %v1082_v16 = vadd.f32 %v1081_v14, %v3515_v24  ;;  %v1321_v54 = vadd.f32 %v3209_v2, %v1215_v34 }
 0x1ce   :  { %v3525_v41 = vpop.f32.mrb[34].mxu0  ;;  %v794_v20 = vpop.f32.mrb[34].mxu1  ;;  %v970_v32 = vld [vmem:[%s4735_s5 + $0x30] sm:$0xff] }
 0x1cf   :  { %879 = vst.msk [vmem:[%s4735_s5 + $0xa0] sm:$0xff] %vm864_vm3, %v794_v20  ;;  %v3534_v60 = vpop.f32.mrb[35].mxu0  ;;  %v2267_v55 = vpop.f32.mrb[35].mxu1  ;;  %v1074_v46 = vsel %vm864_vm3, %v970_v32, 0.0  ;;  %v1210_v14 = vmul.f32 %v970_v32, %v970_v32  ;;  %v1322_v13 = vadd.f32 %v1321_v54, %v1216_v52  ;;  %v1090_v2 = vadd.f32 %v3221_v12, %v3525_v41 }
 0x1d0   :  { %v1075_v34 = vadd.f32 %v1074_v46, %v1073_v40  ;;  %v1222_v4 = vmul.f32 %v3525_v41, %v3525_v41  ;;  %v1223_v23 = vmul.f32 %v3534_v60, %v3534_v60 }
 0x1d1   :  { %v1314_v17 = vsel %vm864_vm3, %v1210_v14, 0.0  ;;  %v1091_v20 = vadd.f32 %v1090_v2, %v3534_v60 }
 0x1d2   :  { %v3545_v22 = vpop.f32.mrb[36].mxu0  ;;  %v799_v55 = vpop.f32.mrb[36].mxu1  ;;  %1076 = vadd.xlane.f32.xlu0 %v1075_v34  ;;  %v977_v54 = vld [vmem:[%s4735_s5 + $0x68] sm:$0xff]  ;;  %v1330_v12 = vadd.f32 %v3233_v19, %v1222_v4  ;;  %v1315_v34 = vadd.f32 %v1314_v17, %v1313_v61 }
 0x1d3   :  { %886 = vst.msk [vmem:[%s4735_s5 + $0xd8] sm:$0xff] %vm864_vm3, %v799_v55  ;;  %v3555_v40 = vpop.f32.mrb[37].mxu0  ;;  %v2270_v52 = vpop.f32.mrb[37].mxu1  ;;  %v1083_v32 = vsel %vm864_vm3, %v977_v54, 0.0  ;;  %v1217_v46 = vmul.f32 %v977_v54, %v977_v54  ;;  %v1229_v14 = vmul.f32 %v3545_v22, %v3545_v22  ;;  %v1099_v2 = vadd.f32 %v3251_v31, %v3545_v22 }
 0x1d4   :  { %v1084_v33 = vadd.f32 %v1083_v32, %v1082_v16  ;;  %v1331_v19 = vadd.f32 %v1330_v12, %v1223_v23  ;;  %v1230_v4 = vmul.f32 %v3555_v40, %v3555_v40 }
 0x1d5   :  { %v1323_v55 = vsel %vm864_vm3, %v1217_v46, 0.0  ;;  %v1339_v10 = vadd.f32 %v3257_v35, %v1229_v14  ;;  %v1100_v52 = vadd.f32 %v1099_v2, %v3555_v40 }
 0x1d6   :  { %v3567_v1 = vpop.f32.mrb[38].mxu0  ;;  %v804_v54 = vpop.f32.mrb[38].mxu1  ;;  %1316 = vadd.xlane.f32.xlu0 %v1315_v34  ;;  %1085 = vadd.xlane.f32.xlu1 %v1084_v33  ;;  %v984_v17 = vld [vmem:[%s4735_s5 + $0xa0] sm:$0xff]  ;;  %v1324_v33 = vadd.f32 %v1323_v55, %v1322_v13 }
 0x1d7   :  { %893 = vst.msk [vmem:[%s4735_s5 + $0x110] sm:$0xff] %vm864_vm3, %v804_v54  ;;  %v3576_v23 = vpop.f32.mrb[39].mxu0  ;;  %v2273_v31 = vpop.f32.mrb[39].mxu1  ;;  %v1092_v35 = vsel %vm864_vm3, %v984_v17, 0.0  ;;  %v1224_v61 = vmul.f32 %v984_v17, %v984_v17  ;;  %v1340_v16 = vadd.f32 %v1339_v10, %v1230_v4  ;;  %v1108_v12 = vadd.f32 %v3269_v45, %v3567_v1 }
 0x1d8   :  { %4842 = vst [vmem:[#allocation44_spill] sm:$0xff] %v3576_v23  ;;  %v1093_v32 = vadd.f32 %v1092_v35, %v1091_v20  ;;  %v1236_v46 = vmul.f32 %v3567_v1, %v3567_v1  ;;  %v1237_v14 = vmul.f32 %v3576_v23, %v3576_v23 }
 0x1d9   :  { %v1332_v2 = vsel %vm864_vm3, %v1224_v61, 0.0  ;;  %v1109_v34 = vadd.f32 %v1108_v12, %v3576_v23 }
 0x1da   :  { %v3587_v54 = vpop.f32.mrb[40].mxu0  ;;  %v809_v31 = vpop.f32.mrb[40].mxu1  ;;  %1325 = vadd.xlane.f32.xlu1 %v1324_v33  ;;  %1094 = vadd.xlane.f32.xlu0 %v1093_v32  ;;  %v991_v10 = vld [vmem:[%s4735_s5 + $0xd8] sm:$0xff]  ;;  %v1348_v45 = vadd.f32 %v3281_v58, %v1236_v46  ;;  %v1333_v35 = vadd.f32 %v1332_v2, %v1331_v19 }
 0x1db   :  { %4843 = vst [vmem:[#allocation45_spill] sm:$0xff] %v3587_v54  ;;  %900 = vst.msk [vmem:[%s4735_s5 + $0x148] sm:$0xff] %vm864_vm3, %v809_v31  ;;  %v3597_v13 = vpop.f32.mrb[41].mxu0  ;;  %v2276_v20 = vpop.f32.mrb[41].mxu1  ;;  %v1231_v4 = vmul.f32 %v991_v10, %v991_v10  ;;  %v1243_v55 = vmul.f32 %v3587_v54, %v3587_v54  ;;  %v1117_v17 = vadd.f32 %v3299_v15, %v3587_v54  ;;  %v1101_v33 = vsel %vm864_vm3, %v991_v10, 0.0 }
 0x1dc   :  { %4844 = vst [vmem:[#allocation46_spill] sm:$0xff] %v3597_v13  ;;  %v1349_v61 = vadd.f32 %v1348_v45, %v1237_v14  ;;  %v1244_v58 = vmul.f32 %v3597_v13, %v3597_v13 }
 0x1dd   :  { %v1341_v12 = vsel %vm864_vm3, %v1231_v4, 0.0  ;;  %v1357_v32 = vadd.f32 %v3305_v21, %v1243_v55  ;;  %v1118_v46 = vadd.f32 %v1117_v17, %v3597_v13 }
 0x1de   :  { %v3609_v31 = vpop.f32.mrb[42].mxu0  ;;  %v814_v20 = vpop.f32.mrb[42].mxu1  ;;  %1334 = vadd.xlane.f32.xlu0 %v1333_v35  ;;  %v1342_v23 = vadd.f32 %v1341_v12, %v1340_v16  ;;  %v998_v15 = vld [vmem:[%s4735_s5 + $0x110] sm:$0xff]  ;;  %v1102_v16 = vadd.f32 %v1101_v33, %v1100_v52 }
 0x1df   :  { %4845 = vst [vmem:[#allocation47_spill] sm:$0xff] %v3609_v31  ;;  %907 = vst.msk [vmem:[%s4735_s5 + $0x180] sm:$0xff] %vm864_vm3, %v814_v20  ;;  %v3618_v19 = vpop.f32.mrb[43].mxu0  ;;  %v2279_v14 = vpop.f32.mrb[43].mxu1  ;;  %v1110_v21 = vsel %vm864_vm3, %v998_v15, 0.0  ;;  %v1238_v2 = vmul.f32 %v998_v15, %v998_v15  ;;  %v1358_v10 = vadd.f32 %v1357_v32, %v1244_v58  ;;  %v1126_v45 = vadd.f32 %v3317_v8, %v3609_v31 }
 0x1e0   :  { %4846 = vst [vmem:[#allocation48_spill] sm:$0xff] %v3618_v19  ;;  %1343 = vadd.xlane.f32.xlu1 %v1342_v23  ;;  %v1250_v4 = vmul.f32 %v3609_v31, %v3609_v31  ;;  %v1251_v55 = vmul.f32 %v3618_v19, %v3618_v19  ;;  %v1111_v58 = vadd.f32 %v1110_v21, %v1109_v34 }
 0x1e1   :  { %v1350_v17 = vsel %vm864_vm3, %v1238_v2, 0.0  ;;  %v1127_v35 = vadd.f32 %v1126_v45, %v3618_v19 }
 0x1e2   :  { %v3629_v12 = vpop.f32.mrb[44].mxu0  ;;  %v819_v20 = vpop.f32.mrb[44].mxu1  ;;  %1103 = vadd.xlane.f32.xlu0 %v1102_v16  ;;  %v1005_v8 = vld [vmem:[%s4735_s5 + $0x148] sm:$0xff]  ;;  %v1366_v52 = vadd.f32 %v3329_v53, %v1250_v4  ;;  %v1351_v14 = vadd.f32 %v1350_v17, %v1349_v61 }
 0x1e3   :  { %4847 = vst [vmem:[#allocation49_spill] sm:$0xff] %v3629_v12  ;;  %914 = vst.msk [vmem:[%s4735_s5 + $0x1b8] sm:$0xff] %vm864_vm3, %v819_v20  ;;  %v2282_v23 = vpop.f32.mrb[45].mxu1  ;;  %v3639_v33 = vpop.f32.mrb[45].mxu0  ;;  %v1245_v32 = vmul.f32 %v1005_v8, %v1005_v8  ;;  %v1257_v15 = vmul.f32 %v3629_v12, %v3629_v12  ;;  %v1135_v34 = vadd.f32 %v3347_v26, %v3629_v12  ;;  %v1119_v45 = vsel %vm864_vm3, %v1005_v8, 0.0 }
 0x1e4   :  { %4848 = vst [vmem:[#allocation50_spill] sm:$0xff] %v3639_v33  ;;  %1112 = vadd.xlane.f32.xlu1 %v1111_v58  ;;  %v1367_v21 = vadd.f32 %v1366_v52, %v1251_v55  ;;  %v1258_v53 = vmul.f32 %v3639_v33, %v3639_v33 }
 0x1e5   :  { %v1359_v2 = vsel %vm864_vm3, %v1245_v32, 0.0  ;;  %v1375_v16 = vadd.f32 %v3353_v39, %v1257_v15  ;;  %v1136_v4 = vadd.f32 %v1135_v34, %v3639_v33 }
 0x1e6   :  { %v3651_v20 = vpop.f32.mrb[46].mxu0  ;;  %v824_v23 = vpop.f32.mrb[46].mxu1  ;;  %1352 = vadd.xlane.f32.xlu0 %v1351_v14  ;;  %v1360_v19 = vadd.f32 %v1359_v2, %v1358_v10  ;;  %v1012_v26 = vld [vmem:[%s4735_s5 + $0x180] sm:$0xff]  ;;  %v1120_v10 = vadd.f32 %v1119_v45, %v1118_v46 }
 0x1e7   :  { %4849 = vst [vmem:[#allocation51_spill] sm:$0xff] %v3651_v20  ;;  %921 = vst.msk [vmem:[%s4735_s5 + $0x1f0] sm:$0xff] %vm864_vm3, %v824_v23  ;;  %v2285_v61 = vpop.f32.mrb[47].mxu1  ;;  %v3660_v55 = vpop.f32.mrb[47].mxu0  ;;  %v1128_v39 = vsel %vm864_vm3, %v1012_v26, 0.0  ;;  %v1252_v17 = vmul.f32 %v1012_v26, %v1012_v26  ;;  %v1376_v58 = vadd.f32 %v1375_v16, %v1258_v53  ;;  %v1144_v8 = vadd.f32 %v3365_v3, %v3651_v20 }
 0x1e8   :  { %4850 = vst [vmem:[#allocation52_spill] sm:$0xff] %v3660_v55  ;;  %1361 = vadd.xlane.f32.xlu1 %v1360_v19  ;;  %v1264_v52 = vmul.f32 %v3651_v20, %v3651_v20  ;;  %v1265_v32 = vmul.f32 %v3660_v55, %v3660_v55  ;;  %v1129_v53 = vadd.f32 %v1128_v39, %v1127_v35 }
 0x1e9   :  { %v1368_v15 = vsel %vm864_vm3, %v1252_v17, 0.0  ;;  %v1145_v34 = vadd.f32 %v1144_v8, %v3660_v55 }
 0x1ea   :  { %v3671_v14 = vpop.f32.mrb[48].mxu0  ;;  %v829_v2 = vpop.f32.mrb[48].mxu1  ;;  %1121 = vadd.xlane.f32.xlu0 %v1120_v10  ;;  %v1019_v3 = vld [vmem:[%s4735_s5 + $0x1b8] sm:$0xff]  ;;  %v1384_v46 = vadd.f32 %v3377_v28, %v1264_v52  ;;  %v1369_v26 = vadd.f32 %v1368_v15, %v1367_v21 }
 0x1eb   :  { %4851 = vst [vmem:[#allocation53_spill] sm:$0xff] %v3671_v14  ;;  %928 = vst.msk [vmem:[%s4735_s5 + $0x228] sm:$0xff] %vm864_vm3, %v829_v2  ;;  %v2288_v19 = vpop.f32.mrb[49].mxu1  ;;  %v3681_v45 = vpop.f32.mrb[49].mxu0  ;;  %v1259_v16 = vmul.f32 %v1019_v3, %v1019_v3  ;;  %v1271_v23 = vmul.f32 %v3671_v14, %v3671_v14  ;;  %v1153_v35 = vadd.f32 %v3395_v6, %v3671_v14  ;;  %v1137_v17 = vsel %vm864_vm3, %v1019_v3, 0.0 }
 0x1ec   :  { %4852 = vst [vmem:[#allocation54_spill] sm:$0xff] %v3681_v45  ;;  %1130 = vadd.xlane.f32.xlu1 %v1129_v53  ;;  %v1385_v61 = vadd.f32 %v1384_v46, %v1265_v32  ;;  %v1272_v28 = vmul.f32 %v3681_v45, %v3681_v45  ;;  %v1063_v46 = vld [vmem:[%s4735_s5 + $0x318] sm:$0xff] }
 0x1ed   :  { %v1377_v39 = vsel %vm864_vm3, %v1259_v16, 0.0  ;;  %v1393_v8 = vadd.f32 %v3401_v11, %v1271_v23  ;;  %v1154_v10 = vadd.f32 %v1153_v35, %v3681_v45  ;;  %v1138_v16 = vadd.f32 %v1137_v17, %v1136_v4 }
 0x1ee   :  { %v3693_v52 = vpop.f32.mrb[50].mxu0  ;;  %v834_v2 = vpop.f32.mrb[50].mxu1  ;;  %1370 = vadd.xlane.f32.xlu0 %v1369_v26  ;;  %v1378_v19 = vadd.f32 %v1377_v39, %v1376_v58  ;;  %v1026_v6 = vld [vmem:[%s4735_s5 + $0x1f0] sm:$0xff] }
 0x1ef   :  { %4853 = vst [vmem:[#allocation55_spill] sm:$0xff] %v3693_v52  ;;  %935 = vst.msk [vmem:[%s4735_s5 + $0x260] sm:$0xff] %vm864_vm3, %v834_v2  ;;  %v2291_v21 = vpop.f32.mrb[51].mxu1  ;;  %v3702_v32 = vpop.f32.mrb[51].mxu0  ;;  %v1146_v11 = vsel %vm864_vm3, %v1026_v6, 0.0  ;;  %v1266_v15 = vmul.f32 %v1026_v6, %v1026_v6  ;;  %v1394_v53 = vadd.f32 %v1393_v8, %v1272_v28  ;;  %v1162_v3 = vadd.f32 %v3413_v27, %v3693_v52  ;;  %v1062_v58 = vld [vmem:[%s4735_s5 + $0x310] sm:$0xff] }
 0x1f0   :  { %4854 = vst [vmem:[#allocation56_spill] sm:$0xff] %v3702_v32  ;;  %1379 = vadd.xlane.f32.xlu1 %v1378_v19  ;;  %v1278_v23 = vmul.f32 %v3693_v52, %v3693_v52  ;;  %v1279_v35 = vmul.f32 %v3702_v32, %v3702_v32  ;;  %v1147_v8 = vadd.f32 %v1146_v11, %v1145_v34 }
 0x1f1   :  { %v1386_v26 = vsel %vm864_vm3, %v1266_v15, 0.0  ;;  %v1163_v27 = vadd.f32 %v1162_v3, %v3702_v32  ;;  %v1302_v17 = vmul.f32 %v1062_v58, %v1062_v58  ;;  %v1303_v19 = vmul.f32 %v1063_v46, %v1063_v46 }
 0x1f2   :  { %v3719_v28 = vpop.f32.mrb[52].mxu0  ;;  %v839_v39 = vpop.f32.mrb[52].mxu1  ;;  %1139 = vadd.xlane.f32.xlu0 %v1138_v16  ;;  %v1033_v2 = vld [vmem:[%s4735_s5 + $0x228] sm:$0xff]  ;;  %v1402_v4 = vadd.f32 %v3425_v48, %v1278_v23  ;;  %v1064_v48 = vld [vmem:[%s4735_s5 + $0x320] sm:$0xff]  ;;  %v1387_v3 = vadd.f32 %v1386_v26, %v1385_v61 }
 0x1f3   :  { %4855 = vst [vmem:[#allocation57_spill] sm:$0xff] %v3719_v28  ;;  %942 = vst.msk [vmem:[%s4735_s5 + $0x298] sm:$0xff] %vm864_vm3, %v839_v39  ;;  %v2294_v6 = vpop.f32.mrb[53].mxu1  ;;  %v3729_v21 = vpop.f32.mrb[53].mxu0  ;;  %v1273_v15 = vmul.f32 %v1033_v2, %v1033_v2  ;;  %v1285_v34 = vmul.f32 %v3719_v28, %v3719_v28  ;;  %v1171_v11 = vadd.f32 %v3443_v47, %v3719_v28  ;;  %v1155_v32 = vsel %vm864_vm3, %v1033_v2, 0.0 }
 0x1f4   :  { %4856 = vst [vmem:[#allocation58_spill] sm:$0xff] %v3729_v21  ;;  %1148 = vadd.xlane.f32.xlu1 %v1147_v8  ;;  %v1403_v16 = vadd.f32 %v1402_v4, %v1279_v35  ;;  %v1286_v23 = vmul.f32 %v3729_v21, %v3729_v21  ;;  %v1195_v39 = vadd.f32 %v1063_v46, %v1062_v58 }
 0x1f5   :  { %v1395_v6 = vsel %vm864_vm3, %v1273_v15, 0.0  ;;  %v1411_v52 = vadd.f32 %v3449_v59, %v1285_v34  ;;  %v1172_v45 = vadd.f32 %v1171_v11, %v3729_v21  ;;  %v1304_v35 = vmul.f32 %v1064_v48, %v1064_v48 }
 0x1f6   :  { %v3744_v47 = vpop.f32.mrb[54].mxu0  ;;  %v844_v28 = vpop.f32.mrb[54].mxu1  ;;  %1388 = vadd.xlane.f32.xlu0 %v1387_v3  ;;  %v1396_v14 = vadd.f32 %v1395_v6, %v1394_v53  ;;  %v1040_v61 = vld [vmem:[%s4735_s5 + $0x260] sm:$0xff]  ;;  %v1435_v26 = vadd.f32 %v1303_v19, %v1302_v17  ;;  %v1156_v4 = vadd.f32 %v1155_v32, %v1154_v10  ;;  %v1196_v15 = vadd.f32 %v1195_v39, %v1064_v48 }
 0x1f7   :  { %4857 = vst [vmem:[#allocation59_spill] sm:$0xff] %v3744_v47  ;;  %949 = vst.msk [vmem:[%s4735_s5 + $0x2d0] sm:$0xff] %vm864_vm3, %v844_v28  ;;  %v2297_v58 = vpop.f32.mrb[55].mxu1  ;;  %v3753_v59 = vpop.f32.mrb[55].mxu0  ;;  %v1164_v46 = vsel %vm864_vm3, %v1040_v61, 0.0  ;;  %v1280_v8 = vmul.f32 %v1040_v61, %v1040_v61  ;;  %v1412_v2 = vadd.f32 %v1411_v52, %v1286_v23  ;;  %v1180_v53 = vadd.f32 %v3463_v25, %v3744_v47  ;;  %v1065_v28 = vld [vmem:[%s4735_s5 + $0x328] sm:$0xff] }
 0x1f8   :  { %4858 = vst [vmem:[#allocation60_spill] sm:$0xff] %v3753_v59  ;;  %1397 = vadd.xlane.f32.xlu1 %v1396_v14  ;;  %v1292_v17 = vmul.f32 %v3744_v47, %v3744_v47  ;;  %v1293_v19 = vmul.f32 %v3753_v59, %v3753_v59  ;;  %v1165_v14 = vadd.f32 %v1164_v46, %v1163_v27 }
 0x1f9   :  { %v1404_v34 = vsel %vm864_vm3, %v1280_v8, 0.0  ;;  %v1181_v52 = vadd.f32 %v1180_v53, %v3753_v59  ;;  %v1436_v3 = vadd.f32 %v1435_v26, %v1304_v35  ;;  %v1305_v27 = vmul.f32 %v1065_v28, %v1065_v28 }
 0x1fa   :  { %v3767_v11 = vpop.f32.mrb[56].mxu0  ;;  %v849_v25 = vpop.f32.mrb[56].mxu1  ;;  %1157 = vadd.xlane.f32.xlu0 %v1156_v4  ;;  %v1047_v10 = vld [vmem:[%s4735_s5 + $0x298] sm:$0xff]  ;;  %v1420_v32 = vadd.f32 %v3469_v49, %v1292_v17  ;;  %v1405_v58 = vadd.f32 %v1404_v34, %v1403_v16  ;;  %v1197_v35 = vadd.f32 %v1196_v15, %v1065_v28 }
 0x1fb   :  { %4859 = vst [vmem:[#allocation61_spill] sm:$0xff] %v3767_v11  ;;  %956 = vst.msk [vmem:[%s4735_s5 + $0x308] sm:$0xff] %vm864_vm3, %v849_v25  ;;  %v2300_v48 = vpop.f32.mrb[57].mxu1  ;;  %v3777_v23 = vpop.f32.mrb[57].mxu0  ;;  %v1287_v39 = vmul.f32 %v1047_v10, %v1047_v10  ;;  %v1189_v6 = vadd.f32 %v3487_v62, %v3767_v11  ;;  %v1299_v61 = vmul.f32 %v3767_v11, %v3767_v11  ;;  %v1173_v8 = vsel %vm864_vm3, %v1047_v10, 0.0 }
 0x1fc   :  { %4860 = vst [vmem:[#allocation62_spill] sm:$0xff] %v3777_v23  ;;  %1166 = vadd.xlane.f32.xlu1 %v1165_v14  ;;  %v1421_v49 = vadd.f32 %v1420_v32, %v1293_v19  ;;  %v1300_v26 = vmul.f32 %v3777_v23, %v3777_v23  ;;  %v1437_v19 = vadd.f32 %v1436_v3, %v1305_v27 }
 0x1fd   :  { %v1413_v46 = vsel %vm864_vm3, %v1287_v39, 0.0  ;;  %v1190_v53 = vadd.f32 %v1189_v6, %v3777_v23  ;;  %v1429_v4 = vadd.f32 %v3493_v44, %v1299_v61  ;;  %v1174_v10 = vadd.f32 %v1173_v8, %v1172_v45 }
 0x1fe   :  { %v3789_v62 = vpop.f32.mrb[58].mxu0  ;;  %v854_v17 = vpop.f32.mrb[58].mxu1  ;;  %1406 = vadd.xlane.f32.xlu0 %v1405_v58  ;;  %v1414_v25 = vadd.f32 %v1413_v46, %v1412_v2  ;;  %v1054_v16 = vld [vmem:[%s4735_s5 + $0x2d0] sm:$0xff] }
 0x1ff   :  { %4861 = vst [vmem:[#allocation63_spill] sm:$0xff] %v3789_v62  ;;  %963 = vst.msk [vmem:[%s4735_s5 + $0x340] sm:$0xff] %vm864_vm3, %v854_v17  ;;  %v2303_v28 = vpop.f32.mrb[59].mxu1  ;;  %v3798_v15 = vpop.f32.mrb[59].mxu0  ;;  %v1182_v44 = vsel %vm864_vm3, %v1054_v16, 0.0  ;;  %v1294_v34 = vmul.f32 %v1054_v16, %v1054_v16  ;;  %v1198_v14 = vadd.f32 %v1197_v35, %v3789_v62  ;;  %v1306_v2 = vmul.f32 %v3789_v62, %v3789_v62 }
 0x200   :  { %4862 = vst [vmem:[#allocation64_spill] sm:$0xff] %v3798_v15  ;;  %1415 = vadd.xlane.f32.xlu1 %v1414_v25  ;;  %v1307_v32 = vmul.f32 %v3798_v15, %v3798_v15  ;;  %v1430_v3 = vadd.f32 %v1429_v4, %v1300_v26  ;;  %v1183_v27 = vadd.f32 %v1182_v44, %v1181_v52 }
 0x201   :  { %v1422_v48 = vsel %vm864_vm3, %v1294_v34, 0.0  ;;  %v1199_v39 = vadd.f32 %v1198_v14, %v3798_v15  ;;  %v1438_v6 = vadd.f32 %v1437_v19, %v1306_v2 }
 0x202   :  { %1175 = vadd.xlane.f32.xlu0 %v1174_v10  ;;  %v1061_v61 = vld [vmem:[%s4735_s5 + $0x308] sm:$0xff]  ;;  %v1423_v35 = vadd.f32 %v1422_v48, %v1421_v49 }
 0x203   :  { %v1439_v58 = vadd.f32 %v1438_v6, %v1307_v32  ;;  %v1191_v45 = vsel %vm864_vm3, %v1061_v61, 0.0  ;;  %v1301_v46 = vmul.f32 %v1061_v61, %v1061_v61 }
 0x204   :  { %1184 = vadd.xlane.f32.xlu1 %v1183_v27  ;;  %v1192_v17 = vadd.f32 %v1191_v45, %v1190_v53 }
 0x205   :  { %v1431_v16 = vsel %vm864_vm3, %v1301_v46, 0.0 }
 0x206   :  { %1424 = vadd.xlane.f32.xlu0 %v1423_v35  ;;  %v1068_v26 = vld [vmem:[%s4735_s5 + $0x340] sm:$0xff]  ;;  %v1432_v19 = vadd.f32 %v1431_v16, %v1430_v3 }
 0x207   :  { %v1200_v8 = vsel %vm864_vm3, %v1068_v26, 0.0  ;;  %v1308_v4 = vmul.f32 %v1068_v26, %v1068_v26 }
 0x208   :  { %v1201_v52 = vadd.f32 %v1200_v8, %v1199_v39 }
 0x209   :  { %v1440_v25 = vsel %vm864_vm3, %v1308_v4, 0.0 }
 0x20a   :  { %1193 = vadd.xlane.f32.xlu0 %v1192_v17  ;;  %1202 = vadd.xlane.f32.xlu1 %v1201_v52  ;;  %v1441_v49 = vadd.f32 %v1440_v25, %v1439_v58 }
 0x20e   :  { %1442 = vadd.xlane.f32.xlu0 %v1441_v49  ;;  %1433 = vadd.xlane.f32.xlu1 %v1432_v19 }
 0x25f   :  { %v1077_v28 = vpop.xlane.xlu0 %1076 }
 0x260   :  { %v1444_v44 = vmul.f32 0.0012755102, %v1077_v28 }
 0x262   :  { %v1474_v2 = vmul.f32 %v1444_v44, %v1444_v44 }
 0x263   :  { %v1317_v34 = vpop.xlane.xlu0 %1316  ;;  %v1086_v14 = vpop.xlane.xlu1 %1085 }
 0x264   :  { %v1459_v10 = vmul.f32 0.0012755102, %v1317_v34  ;;  %v3818_v32 = vmul.f32 0.0012755102, %v1086_v14 }
 0x266   :  { %v1489_v53 = vsub.f32 %v1459_v10, %v1474_v2  ;;  %v1475_v27 = vmul.f32 %v3818_v32, %v3818_v32 }
 0x267   :  { %v1326_v48 = vpop.xlane.xlu1 %1325  ;;  %v1095_v39 = vpop.xlane.xlu0 %1094 }
 0x268   :  { %v1504_v6 = vmax.f32 %v1489_v53, 0.0  ;;  %v1460_v61 = vmul.f32 0.0012755102, %v1326_v48  ;;  %v3822_v58 = vmul.f32 0.0012755102, %v1095_v39 }
 0x26a   :  { %v1534_v3 = vadd.f32 1e-05, %v1504_v6  ;;  %v1490_v35 = vsub.f32 %v1460_v61, %v1475_v27  ;;  %v1476_v26 = vmul.f32 %v3822_v58, %v3822_v58  ;;  %v3837_v6 = vld [vmem:[%s4736_s4] sm:$0xff] }
 0x26b   :  { %v1335_v45 = vpop.xlane.xlu0 %1334 }
 0x26c   :  { %2423 = vrsqrt.f32 %v1534_v3  ;;  %v1505_v46 = vmax.f32 %v1490_v35, 0.0  ;;  %v1461_v8 = vmul.f32 0.0012755102, %v1335_v45 }
 0x26d   :  { %v1344_v4 = vpop.xlane.xlu1 %1343 }
 0x26e   :  { %v1535_v17 = vadd.f32 1e-05, %v1505_v46  ;;  %v1491_v52 = vsub.f32 %v1461_v8, %v1476_v26  ;;  %v1462_v34 = vmul.f32 0.0012755102, %v1344_v4 }
 0x26f   :  { %v1104_v25 = vpop.xlane.xlu0 %1103 }
 0x270   :  { %2425 = vrsqrt.f32 %v1535_v17  ;;  %v1506_v16 = vmax.f32 %v1491_v52, 0.0  ;;  %v3826_v49 = vmul.f32 0.0012755102, %v1104_v25  ;;  %v3845_v17 = vld [vmem:[%s4736_s4 + $0x8] sm:$0xff] }
 0x271   :  { %v1113_v19 = vpop.xlane.xlu1 %1112 }
 0x272   :  { %v1536_v28 = vadd.f32 1e-05, %v1506_v16  ;;  %v1477_v14 = vmul.f32 %v3826_v49, %v3826_v49  ;;  %v3830_v2 = vmul.f32 0.0012755102, %v1113_v19 }
 0x273   :  { %v1353_v10 = vpop.xlane.xlu0 %1352 }
 0x274   :  { %2427 = vrsqrt.f32 %v1536_v28  ;;  %v1492_v53 = vsub.f32 %v1462_v34, %v1477_v14  ;;  %v1478_v48 = vmul.f32 %v3830_v2, %v3830_v2  ;;  %v1463_v39 = vmul.f32 0.0012755102, %v1353_v10 }
 0x275   :  { %v1362_v27 = vpop.xlane.xlu1 %1361 }
 0x276   :  { %v2424_v61 = vpop.eup %2423  ;;  %v1507_v3 = vmax.f32 %v1492_v53, 0.0  ;;  %v1493_v35 = vsub.f32 %v1463_v39, %v1478_v48  ;;  %v1464_v52 = vmul.f32 0.0012755102, %v1362_v27 }
 0x277   :  { %v1122_v45 = vpop.xlane.xlu0 %1121  ;;  %v1564_v46 = vmul.f32 %v2424_v61, %v3837_v6  ;;  %v3859_v61 = vld [vmem:[%s4736_s4 + $0x10] sm:$0xff] }
 0x278   :  { %v1537_v26 = vadd.f32 1e-05, %v1507_v3  ;;  %v1508_v8 = vmax.f32 %v1493_v35, 0.0  ;;  %v3840_v4 = vmul.f32 0.0012755102, %v1122_v45 }
 0x279   :  { %v1131_v25 = vpop.xlane.xlu1 %1130  ;;  %1671 = vperm.xlu1 %2416, %v1564_v46   ;;  %v1579_v10 = vmul.f32 %v1564_v46, %v1444_v44 }
 0x27a   :  { %v2426_v16 = vpop.eup %2425  ;;  %2429 = vrsqrt.f32 %v1537_v26  ;;  %v1538_v19 = vadd.f32 1e-05, %v1508_v8  ;;  %v1479_v28 = vmul.f32 %v3840_v4, %v3840_v4  ;;  %v3849_v34 = vmul.f32 0.0012755102, %v1131_v25 }
 0x27b   :  { %v1371_v14 = vpop.xlane.xlu0 %1370  ;;  %v3852_v53 = vmul.f32 %v2426_v16, %v3845_v17 }
 0x27c   :  { %2431 = vrsqrt.f32 %v1538_v19  ;;  %v1494_v48 = vsub.f32 %v1464_v52, %v1479_v28  ;;  %v1480_v39 = vmul.f32 %v3849_v34, %v3849_v34  ;;  %v1465_v27 = vmul.f32 0.0012755102, %v1371_v14 }
 0x27d   :  { %v1380_v3 = vpop.xlane.xlu1 %1379  ;;  %1609 = vrot.lane.b32.xlu1 %v1579_v10, %s2476_s29  ;;  %v1580_v44 = vmul.f32 %v3852_v53, %v3818_v32  ;;  %v3875_v32 = vld [vmem:[%s4736_s4 + $0x18] sm:$0xff] }
 0x27e   :  { %v2428_v35 = vpop.eup %2427  ;;  %v1509_v45 = vmax.f32 %v1494_v48, 0.0  ;;  %v1495_v46 = vsub.f32 %v1465_v27, %v1480_v39  ;;  %v1466_v19 = vmul.f32 0.0012755102, %v1380_v3 }
 0x27f   :  { %v1140_v26 = vpop.xlane.xlu0 %1139  ;;  %1611 = vrot.lane.b32.xlu0 %v1580_v44, %s2476_s29  ;;  %v3866_v8 = vmul.f32 %v2428_v35, %v3859_v61 }
 0x280   :  { %v1539_v52 = vadd.f32 1e-05, %v1509_v45  ;;  %v1510_v25 = vmax.f32 %v1495_v46, 0.0  ;;  %v3868_v16 = vmul.f32 0.0012755102, %v1140_v26  ;;  %v3887_v45 = vld [vmem:[%s4736_s4 + $0x20] sm:$0xff] }
 0x281   :  { %v1149_v28 = vpop.xlane.xlu1 %1148  ;;  %v1581_v14 = vmul.f32 %v3866_v8, %v3822_v58 }
 0x282   :  { %2433 = vrsqrt.f32 %v1539_v52  ;;  %v1540_v10 = vadd.f32 1e-05, %v1510_v25  ;;  %v1481_v48 = vmul.f32 %v3868_v16, %v3868_v16  ;;  %v3879_v39 = vmul.f32 0.0012755102, %v1149_v28 }
 0x283   :  { %v1389_v27 = vpop.xlane.xlu0 %1388  ;;  %1613 = vrot.lane.b32.xlu1 %v1581_v14, %s2476_s29 }
 0x284   :  { %v2430_v3 = vpop.eup %2429  ;;  %2435 = vrsqrt.f32 %v1540_v10  ;;  %v1496_v44 = vsub.f32 %v1466_v19, %v1481_v48  ;;  %v1482_v58 = vmul.f32 %v3879_v39, %v3879_v39  ;;  %v1467_v35 = vmul.f32 0.0012755102, %v1389_v27 }
 0x285   :  { %v3890_v46 = vmul.f32 %v2430_v3, %v3875_v32  ;;  %v1398_v26 = vpop.xlane.xlu1 %1397 }
 0x286   :  { %v2432_v52 = vpop.eup %2431  ;;  %v1511_v25 = vmax.f32 %v1496_v44, 0.0  ;;  %v1497_v28 = vsub.f32 %v1467_v35, %v1482_v58  ;;  %v1468_v62 = vmul.f32 0.0012755102, %v1398_v26  ;;  %v3905_v44 = vld [vmem:[%s4736_s4 + $0x28] sm:$0xff] }
 0x287   :  { %v1582_v14 = vmul.f32 %v3890_v46, %v3826_v49  ;;  %v1158_v19 = vpop.xlane.xlu0 %1157  ;;  %v3895_v10 = vmul.f32 %v2432_v52, %v3887_v45 }
 0x288   :  { %v1541_v48 = vadd.f32 1e-05, %v1511_v25  ;;  %v1512_v27 = vmax.f32 %v1497_v28, 0.0  ;;  %v3897_v15 = vmul.f32 0.0012755102, %v1158_v19 }
 0x289   :  { %v1167_v23 = vpop.xlane.xlu1 %1166  ;;  %1615 = vrot.lane.b32.xlu1 %v1582_v14, %s2476_s29  ;;  %v1583_v3 = vmul.f32 %v3895_v10, %v3830_v2  ;;  %v3917_v14 = vld [vmem:[%s4736_s4 + $0x30] sm:$0xff] }
 0x28a   :  { %2437 = vrsqrt.f32 %v1541_v48  ;;  %v1542_v49 = vadd.f32 1e-05, %v1512_v27  ;;  %v1483_v58 = vmul.f32 %v3897_v15, %v3897_v15  ;;  %v3909_v35 = vmul.f32 0.0012755102, %v1167_v23 }
 0x28b   :  { %v1407_v52 = vpop.xlane.xlu0 %1406  ;;  %1617 = vrot.lane.b32.xlu0 %v1583_v3, %s2476_s29 }
 0x28c   :  { %v2434_v26 = vpop.eup %2433  ;;  %2439 = vrsqrt.f32 %v1542_v49  ;;  %v1498_v25 = vsub.f32 %v1468_v62, %v1483_v58  ;;  %v1484_v2 = vmul.f32 %v3909_v35, %v3909_v35  ;;  %v1469_v28 = vmul.f32 0.0012755102, %v1407_v52 }
 0x28d   :  { %v3920_v19 = vmul.f32 %v2434_v26, %v3905_v44  ;;  %v1416_v23 = vpop.xlane.xlu1 %1415 }
 0x28e   :  { %v2436_v48 = vpop.eup %2435  ;;  %v1513_v27 = vmax.f32 %v1498_v25, 0.0  ;;  %v1499_v11 = vsub.f32 %v1469_v28, %v1484_v2  ;;  %v1470_v47 = vmul.f32 0.0012755102, %v1416_v23  ;;  %v3935_v25 = vld [vmem:[%s4736_s4 + $0x38] sm:$0xff] }
 0x28f   :  { %v1584_v3 = vmul.f32 %v3920_v19, %v3840_v4  ;;  %v1176_v62 = vpop.xlane.xlu0 %1175  ;;  %v3925_v49 = vmul.f32 %v2436_v48, %v3917_v14 }
 0x290   :  { %v1543_v58 = vadd.f32 1e-05, %v1513_v27  ;;  %v1514_v52 = vmax.f32 %v1499_v11, 0.0  ;;  %v3927_v59 = vmul.f32 0.0012755102, %v1176_v62 }
 0x291   :  { %v1185_v21 = vpop.xlane.xlu1 %1184  ;;  %1619 = vrot.lane.b32.xlu1 %v1584_v3, %s2476_s29  ;;  %v1585_v26 = vmul.f32 %v3925_v49, %v3849_v34  ;;  %v3943_v34 = vld [vmem:[%s4736_s4 + $0x40] sm:$0xff] }
 0x292   :  { %2441 = vrsqrt.f32 %v1543_v58  ;;  %v1544_v4 = vadd.f32 1e-05, %v1514_v52  ;;  %v1485_v2 = vmul.f32 %v3927_v59, %v3927_v59  ;;  %v1456_v11 = vmul.f32 0.0012755102, %v1185_v21 }
 0x293   :  { %v1425_v28 = vpop.xlane.xlu0 %1424  ;;  %1621 = vrot.lane.b32.xlu0 %v1585_v26, %s2476_s29 }
 0x294   :  { %v2438_v23 = vpop.eup %2437  ;;  %2443 = vrsqrt.f32 %v1544_v4  ;;  %v1500_v48 = vsub.f32 %v1470_v47, %v1485_v2  ;;  %v1486_v27 = vmul.f32 %v1456_v11, %v1456_v11  ;;  %v1471_v3 = vmul.f32 0.0012755102, %v1425_v28 }
 0x295   :  { %v3946_v62 = vmul.f32 %v2438_v23, %v3935_v25  ;;  %v3956_v23 = vld [vmem:[%s4736_s4 + $0x48] sm:$0xff] }
 0x296   :  { %v2440_v58 = vpop.eup %2439  ;;  %v1515_v52 = vmax.f32 %v1500_v48, 0.0  ;;  %v1501_v55 = vsub.f32 %v1471_v3, %v1486_v27 }
 0x297   :  { %v1586_v21 = vmul.f32 %v3946_v62, %v3868_v16  ;;  %v1194_v26 = vpop.xlane.xlu0 %1193  ;;  %v1203_v20 = vpop.xlane.xlu1 %1202  ;;  %v1572_v47 = vmul.f32 %v2440_v58, %v3943_v34 }
 0x298   :  { %v1545_v4 = vadd.f32 1e-05, %v1515_v52  ;;  %v1516_v2 = vmax.f32 %v1501_v55, 0.0  ;;  %v1457_v28 = vmul.f32 0.0012755102, %v1194_v26 }
 0x299   :  { %v1458_v33 = vmul.f32 0.0012755102, %v1203_v20  ;;  %1623 = vrot.lane.b32.xlu1 %v1586_v21, %s2476_s29  ;;  %v1587_v12 = vmul.f32 %v1572_v47, %v3879_v39  ;;  %v3962_v39 = vld [vmem:[%s4736_s4 + $0x50] sm:$0xff] }
 0x29a   :  { %2445 = vrsqrt.f32 %v1545_v4  ;;  %v1546_v48 = vadd.f32 1e-05, %v1516_v2  ;;  %v1487_v16 = vmul.f32 %v1457_v28, %v1457_v28 }
 0x29b   :  { %1625 = vrot.lane.b32.xlu0 %v1587_v12, %s2476_s29  ;;  %v1443_v27 = vpop.xlane.xlu0 %1442  ;;  %v1434_v3 = vpop.xlane.xlu1 %1433  ;;  %v1488_v55 = vmul.f32 %v1458_v33, %v1458_v33 }
 0x29c   :  { %v2442_v58 = vpop.eup %2441  ;;  %2447 = vrsqrt.f32 %v1546_v48  ;;  %v1473_v20 = vmul.f32 0.0012755102, %v1443_v27  ;;  %v1472_v52 = vmul.f32 0.0012755102, %v1434_v3  ;;  %v3972_v27 = vld [vmem:[%s4736_s4 + $0x58] sm:$0xff] }
 0x29d   :  { %v1573_v21 = vmul.f32 %v2442_v58, %v3956_v23 }
 0x29e   :  { %v2444_v26 = vpop.eup %2443  ;;  %v1503_v4 = vsub.f32 %v1473_v20, %v1488_v55  ;;  %v1502_v2 = vsub.f32 %v1472_v52, %v1487_v16  ;;  %v3993_v52 = vld [vmem:[%s4736_s4 + $0x68] sm:$0xff] }
 0x29f   :  { %v1588_v31 = vmul.f32 %v1573_v21, %v3897_v15  ;;  %v1574_v12 = vmul.f32 %v2444_v26, %v3962_v39  ;;  %v3978_v15 = vld [vmem:[%s4736_s4 + $0x60] sm:$0xff] }
 0x2a0   :  { %v1518_v13 = vmax.f32 %v1503_v4, 0.0  ;;  %v1517_v54 = vmax.f32 %v1502_v2, 0.0 }
 0x2a1   :  { %1627 = vrot.lane.b32.xlu1 %v1588_v31, %s2476_s29  ;;  %v1589_v48 = vmul.f32 %v1574_v12, %v3909_v35 }
 0x2a2   :  { %v1548_v3 = vadd.f32 1e-05, %v1518_v13  ;;  %v1547_v58 = vadd.f32 1e-05, %v1517_v54  ;;  %v3988_v13 = vld [vmem:[%s4736_s4 + $0x70] sm:$0xff] }
 0x2a3   :  { %1629 = vrot.lane.b32.xlu0 %v1589_v48, %s2476_s29 }
 0x2a4   :  { %v2446_v16 = vpop.eup %2445  ;;  %2449 = vrsqrt.f32 %v1548_v3 }
 0x2a5   :  { %v1575_v31 = vmul.f32 %v2446_v16, %v3972_v27  ;;  %2451 = vrsqrt.f32 %v1547_v58 }
 0x2a6   :  { %v2448_v35 = vpop.eup %2447 }
 0x2a7   :  { %v1590_v55 = vmul.f32 %v1575_v31, %v3927_v59  ;;  %v1576_v20 = vmul.f32 %v2448_v35, %v3978_v15 }
 0x2a9   :  { %1631 = vrot.lane.b32.xlu1 %v1590_v55, %s2476_s29  ;;  %v1591_v54 = vmul.f32 %v1576_v20, %v1456_v11 }
 0x2ab   :  { %1633 = vrot.lane.b32.xlu0 %v1591_v54, %s2476_s29 }
 0x2ae   :  { %v2450_v26 = vpop.eup %2449 }
 0x2af   :  { %v2452_v4 = vpop.eup %2451  ;;  %v1578_v59 = vmul.f32 %v2450_v26, %v3988_v13 }
 0x2b0   :  { %v1577_v2 = vmul.f32 %v2452_v4, %v3993_v52 }
 0x2b1   :  { %v1593_v48 = vmul.f32 %v1578_v59, %v1458_v33  ;;  %v2477_v33 = vmov 1  }
 0x2b2   :  { %v1592_v11 = vmul.f32 %v1577_v2, %v1457_v28 }
 0x2b3   :  { %1637 = vrot.lane.b32.xlu0 %v1593_v48, %s2476_s29 }
 0x2b4   :  { %1635 = vrot.lane.b32.xlu1 %v1592_v11, %s2476_s29 }
 0x2b7   :  { %1676 = vperm.xlu0 %2415, %v3852_v53  }
 0x2b8   :  { %1681 = vperm.xlu1 %2416, %v3866_v8  }
 0x2bb   :  { %1686 = vperm.xlu0 %2415, %v3890_v46  }
 0x2bc   :  { %1691 = vperm.xlu1 %2416, %v3895_v10  }
 0x2bf   :  { %1696 = vperm.xlu0 %2415, %v3920_v19  }
 0x2c0   :  { %1701 = vperm.xlu1 %2416, %v3925_v49  }
 0x2c3   :  { %1706 = vperm.xlu0 %2415, %v3946_v62  }
 0x2c4   :  { %1711 = vperm.xlu1 %2416, %v1572_v47  }
 0x2c7   :  { %1716 = vperm.xlu0 %2415, %v1573_v21  }
 0x2c8   :  { %1721 = vperm.xlu1 %2416, %v1574_v12  }
 0x2cb   :  { %1726 = vperm.xlu0 %2415, %v1575_v31  }
 0x2cc   :  { %1731 = vperm.xlu1 %2416, %v1576_v20  }
 0x2cf   :  { %1736 = vperm.xlu0 %2415, %v1577_v2  }
 0x2d0   :  { %1741 = vperm.xlu1 %2416, %v1578_v59  }
 0x2d3   :  { %2417 = vset.pattern.permute.xlu0 %v2477_v33 }
 0x2d4   :  { %2418 = vset.pattern.permute.xlu1 %v2477_v33 }
 0x2f1   :  { %v1612_v53 = vpop.permute.xlu0 %1611 }
 0x2f2   :  { %v1655_v8 = vsub.f32 %v3845_v17, %v1612_v53 }
 0x2f4   :  { %1856 = vperm.xlu1 %2418, %v1655_v8  }
 0x2f8   :  { %v4007_v46 = vpop.permute.xlu1 %1671 }
 0x2f9   :  { %v4011_v10 = vmul.f32 %v4007_v46, %v3145_v5  ;;  %v4015_v19 = vmul.f32 %v4007_v46, %v3149_v18  ;;  %v4019_v49 = vmul.f32 %v4007_v46, %v3147_v7  ;;  %v4023_v62 = vmul.f32 %v4007_v46, %v3151_v29 }
 0x2fa   :  { %v4027_v17 = vmul.f32 %v4007_v46, %v3491_v63  ;;  %v4031_v5 = vmul.f32 %v4007_v46, %v3499_v30 }
 0x2fc   :  { %v1610_v47 = vpop.permute.xlu1 %1609 }
 0x2fd   :  { %v1654_v18 = vsub.f32 %v3837_v6, %v1610_v47  ;;  %v1618_v21 = vpop.permute.xlu0 %1617 }
 0x2fe   :  { %v1658_v29 = vsub.f32 %v3887_v45, %v1618_v21 }
 0x2ff   :  { %1851 = vperm.xlu0 %2417, %v1654_v18  }
 0x300   :  { %v1614_v28 = vpop.permute.xlu1 %1613 }
 0x301   :  { %v1656_v7 = vsub.f32 %v3859_v61, %v1614_v28 }
 0x303   :  { %1861 = vperm.xlu1 %2418, %v1656_v7  }
 0x304   :  { %v1616_v12 = vpop.permute.xlu1 %1615 }
 0x305   :  { %v1657_v3 = vsub.f32 %v3875_v32, %v1616_v12  ;;  %v1622_v63 = vpop.permute.xlu0 %1621 }
 0x306   :  { %v1660_v30 = vsub.f32 %v3917_v14, %v1622_v63 }
 0x307   :  { %1871 = vperm.xlu1 %2418, %v1658_v29   ;;  %1866 = vperm.xlu0 %2417, %v1657_v3   ;;  %v2453_v29 = vld [vmem:[%s4735_s5 + $0x68] sm:$0xff] }
 0x308   :  { %v1620_v58 = vpop.permute.xlu1 %1619 }
 0x309   :  { %v1659_v16 = vsub.f32 %v3905_v44, %v1620_v58 }
 0x30b   :  { %1881 = vperm.xlu1 %2418, %v1660_v30   ;;  %1876 = vperm.xlu0 %2417, %v1659_v16  }
 0x30c   :  { %v1624_v6 = vpop.permute.xlu1 %1623 }
 0x30d   :  { %v1661_v61 = vsub.f32 %v3935_v25, %v1624_v6  ;;  %v1626_v31 = vpop.permute.xlu0 %1625 }
 0x30e   :  { %v1662_v35 = vsub.f32 %v3943_v34, %v1626_v31 }
 0x30f   :  { %1886 = vperm.xlu0 %2417, %v1661_v61  }
 0x310   :  { %1891 = vperm.xlu1 %2418, %v1662_v35  }
 0x313   :  { %v1628_v45 = vpop.permute.xlu1 %1627 }
 0x314   :  { %v1663_v32 = vsub.f32 %v3956_v23, %v1628_v45 }
 0x315   :  { %v1630_v55 = vpop.permute.xlu0 %1629 }
 0x316   :  { %v1664_v20 = vsub.f32 %v3962_v39, %v1630_v55  ;;  %1896 = vperm.xlu0 %2417, %v1663_v32  }
 0x318   :  { %1901 = vperm.xlu1 %2418, %v1664_v20   ;;  %v2455_v20 = vld [vmem:[%s4735_s5 + $0xa0] sm:$0xff] }
 0x31b   :  { %v1632_v14 = vpop.permute.xlu1 %1631 }
 0x31c   :  { %v1665_v44 = vsub.f32 %v3972_v27, %v1632_v14 }
 0x31d   :  { %v1634_v54 = vpop.permute.xlu0 %1633 }
 0x31e   :  { %v1666_v26 = vsub.f32 %v3978_v15, %v1634_v54  ;;  %1906 = vperm.xlu0 %2417, %v1665_v44  }
 0x320   :  { %1911 = vperm.xlu1 %2418, %v1666_v26   ;;  %v4865_v26 = vld [vmem:[#allocation4_spill] sm:$0xff] }
 0x325   :  { %v1638_v25 = vpop.permute.xlu0 %1637 }
 0x326   :  { %v1668_v34 = vsub.f32 %v3988_v13, %v1638_v25  ;;  %v1636_v4 = vpop.permute.xlu1 %1635 }
 0x327   :  { %v1667_v59 = vsub.f32 %v3993_v52, %v1636_v4 }
 0x328   :  { %1921 = vperm.xlu1 %2418, %v1668_v34   ;;  %v4866_v34 = vld [vmem:[#allocation6_spill] sm:$0xff] }
 0x329   :  { %1916 = vperm.xlu0 %2417, %v1667_v59   ;;  %v4867_v59 = vld [vmem:[#allocation5_spill] sm:$0xff] }
 0x336   :  { %v1677_v2 = vpop.permute.xlu0 %1676 }
 0x337   :  { %v1682_v23 = vpop.permute.xlu1 %1681  ;;  %v1751_v47 = vmul.f32 %v1677_v2, %v3159_v37  ;;  %v1752_v18 = vmul.f32 %v1677_v2, %v3166_v42  ;;  %v1753_v28 = vmul.f32 %v1677_v2, %v3161_v38  ;;  %v1754_v7 = vmul.f32 %v1677_v2, %v3168_v43  ;;  %v2454_v43 = vld [vmem:[%s4735_s5 + $0x30] sm:$0xff] }
 0x338   :  { %v1755_v21 = vmul.f32 %v1677_v2, %v3509_v36  ;;  %v1756_v12 = vmul.f32 %v1677_v2, %v3515_v24  ;;  %v1757_v3 = vmul.f32 %v2453_v29, %v1677_v2  ;;  %v1750_v36 = vmul.f32 %v2454_v43, %v4007_v46 }
 0x339   :  { %v1758_v24 = vmul.f32 %v1682_v23, %v3181_v50  ;;  %v1759_v31 = vmul.f32 %v1682_v23, %v3190_v56  ;;  %v1760_v35 = vmul.f32 %v1682_v23, %v3183_v51  ;;  %v1761_v45 = vmul.f32 %v1682_v23, %v3192_v57  ;;  %v4863_v56 = vld [vmem:[#allocation2_spill] sm:$0xff]  ;;  %v4864_v51 = vld [vmem:[#allocation3_spill] sm:$0xff] }
 0x33a   :  { %v1687_v11 = vpop.permute.xlu0 %1686  ;;  %v1762_v32 = vmul.f32 %v1682_v23, %v3525_v41  ;;  %v1763_v55 = vmul.f32 %v1682_v23, %v3534_v60  ;;  %v1764_v14 = vmul.f32 %v2455_v20, %v1682_v23 }
 0x33b   :  { %v1692_v39 = vpop.permute.xlu1 %1691  ;;  %v4110_v44 = vmul.f32 %v1687_v11, %v3205_v0  ;;  %v4113_v50 = vmul.f32 %v1687_v11, %v3214_v9  ;;  %v4116_v46 = vmul.f32 %v1687_v11, %v4863_v56  ;;  %v4119_v57 = vmul.f32 %v1687_v11, %v4864_v51  ;;  %v2456_v0 = vld [vmem:[%s4735_s5 + $0xd8] sm:$0xff]  ;;  %v2458_v56 = vld [vmem:[%s4735_s5 + $0x148] sm:$0xff] }
 0x33c   :  { %v4124_v60 = vmul.f32 %v1687_v11, %v3545_v22  ;;  %v4127_v54 = vmul.f32 %v1687_v11, %v3555_v40  ;;  %v4132_v9 = vmul.f32 %v2456_v0, %v1687_v11  ;;  %v4135_v25 = vmul.f32 %v1692_v39, %v4865_v26  ;;  %v4868_v22 = vld [vmem:[#allocation7_spill] sm:$0xff]  ;;  %v2457_v11 = vld [vmem:[%s4735_s5 + $0x110] sm:$0xff] }
 0x33d   :  { %v4138_v4 = vmul.f32 %v1692_v39, %v4866_v34  ;;  %v4141_v23 = vmul.f32 %v1692_v39, %v4867_v59  ;;  %v4144_v2 = vmul.f32 %v1692_v39, %v4868_v22  ;;  %v4147_v40 = vmul.f32 %v1692_v39, %v3567_v1  ;;  %v4876_v59 = vld [vmem:[#allocation12_spill] sm:$0xff] }
 0x33e   :  { %v4051_v33 = vpop.permute.xlu0 %1696 }
 0x33f   :  { %v4047_v48 = vpop.permute.xlu1 %1701  ;;  %v4189_v51 = vmul.f32 %v2458_v56, %v4051_v33 }
 0x342   :  { %v4055_v53 = vpop.permute.xlu0 %1706 }
 0x343   :  { %v4049_v27 = vpop.permute.xlu1 %1711 }
 0x346   :  { %v4059_v8 = vpop.permute.xlu0 %1716 }
 0x347   :  { %v4053_v15 = vpop.permute.xlu1 %1721 }
 0x34a   :  { %v4072_v58 = vpop.permute.xlu0 %1726 }
 0x34b   :  { %v4057_v13 = vpop.permute.xlu1 %1731 }
 0x34e   :  { %v4121_v41 = vpop.permute.xlu0 %1736 }
 0x34f   :  { %v4061_v52 = vpop.permute.xlu1 %1741 }
 0x373   :  { %v1857_v63 = vpop.permute.xlu1 %1856 }
 0x374   :  { %v1931_v30 = vadd.f32 %v1857_v63, %v1751_v47  ;;  %v1932_v37 = vadd.f32 %v1857_v63, %v1752_v18  ;;  %v1933_v16 = vadd.f32 %v1857_v63, %v1753_v28  ;;  %v1934_v42 = vadd.f32 %v1857_v63, %v1754_v7  ;;  %v4869_v47 = vld [vmem:[#allocation44_spill] sm:$0xff] }
 0x375   :  { %v1935_v6 = vadd.f32 %v1857_v63, %v1755_v21  ;;  %v1936_v38 = vadd.f32 %v1857_v63, %v1756_v12  ;;  %v1937_v61 = vadd.f32 %v1857_v63, %v1757_v3  ;;  %v4150_v18 = vmul.f32 %v1692_v39, %v4869_v47  ;;  %v4870_v7 = vld [vmem:[#allocation8_spill] sm:$0xff]  ;;  %v4871_v12 = vld [vmem:[#allocation10_spill] sm:$0xff]  ;;  %v4872_v3 = vld [vmem:[#allocation9_spill] sm:$0xff] }
 0x376   :  { %2036 = vst [vmem:[%s4735_s5 + $0x38] sm:$0xff] %v1931_v30  ;;  %2037 = vst [vmem:[%s4735_s5 + $0x40] sm:$0xff] %v1932_v37  ;;  %v4155_v28 = vmul.f32 %v2457_v11, %v1692_v39  ;;  %v4159_v21 = vmul.f32 %v4051_v33, %v4870_v7  ;;  %v4163_v29 = vmul.f32 %v4051_v33, %v4871_v12  ;;  %v4873_v63 = vld [vmem:[#allocation11_spill] sm:$0xff]  ;;  %v4874_v37 = vld [vmem:[#allocation45_spill] sm:$0xff] }
 0x377   :  { %2038 = vst [vmem:[%s4735_s5 + $0x48] sm:$0xff] %v1933_v16  ;;  %2039 = vst [vmem:[%s4735_s5 + $0x50] sm:$0xff] %v1934_v42  ;;  %v4167_v1 = vmul.f32 %v4051_v33, %v4872_v3  ;;  %v4171_v30 = vmul.f32 %v4051_v33, %v4873_v63  ;;  %v4175_v39 = vmul.f32 %v4051_v33, %v4874_v37  ;;  %v4875_v16 = vld [vmem:[#allocation46_spill] sm:$0xff]  ;;  %v4879_v47 = vld [vmem:[#allocation15_spill] sm:$0xff] }
 0x378   :  { %2040 = vst [vmem:[%s4735_s5 + $0x58] sm:$0xff] %v1935_v6  ;;  %2041 = vst [vmem:[%s4735_s5 + $0x60] sm:$0xff] %v1936_v38  ;;  %v4179_v42 = vmul.f32 %v4051_v33, %v4875_v16  ;;  %v4207_v33 = vmul.f32 %v4047_v48, %v4879_v47  ;;  %v2459_v7 = vld [vmem:[%s4735_s5 + $0x180] sm:$0xff]  ;;  %v4882_v3 = vld [vmem:[#allocation16_spill] sm:$0xff] }
 0x379   :  { %2042 = vst.msk [vmem:[%s4735_s5 + $0x68] sm:$0xff] %vm864_vm3, %v1937_v61  ;;  %v4233_v12 = vmul.f32 %v2459_v7, %v4047_v48  ;;  %v4237_v63 = vmul.f32 %v4055_v53, %v4882_v3  ;;  %v4889_v47 = vld [vmem:[#allocation22_spill] sm:$0xff] }
 0x37e   :  { %v1852_v6 = vpop.permute.xlu0 %1851 }
 0x37f   :  { %v1924_v38 = vadd.f32 %v1852_v6, %v4011_v10  ;;  %v1925_v61 = vadd.f32 %v1852_v6, %v4015_v19  ;;  %v1926_v43 = vadd.f32 %v1852_v6, %v4019_v49  ;;  %v1927_v20 = vadd.f32 %v1852_v6, %v4023_v62  ;;  %v4877_v19 = vld [vmem:[#allocation14_spill] sm:$0xff]  ;;  %v4878_v62 = vld [vmem:[#allocation13_spill] sm:$0xff] }
 0x380   :  { %v1928_v0 = vadd.f32 %v1852_v6, %v4027_v17  ;;  %v1929_v26 = vadd.f32 %v1852_v6, %v4031_v5  ;;  %v1930_v34 = vadd.f32 %v1852_v6, %v1750_v36  ;;  %v4195_v10 = vmul.f32 %v4047_v48, %v4876_v59  ;;  %v4880_v17 = vld [vmem:[#allocation47_spill] sm:$0xff]  ;;  %v4881_v36 = vld [vmem:[#allocation48_spill] sm:$0xff]  ;;  %v4884_v59 = vld [vmem:[#allocation17_spill] sm:$0xff] }
 0x381   :  { %v4199_v49 = vmul.f32 %v4047_v48, %v4877_v19  ;;  %v4203_v22 = vmul.f32 %v4047_v48, %v4878_v62  ;;  %2029 = vst [vmem:[%s4735_s5] sm:$0xff] %v1924_v38  ;;  %2030 = vst [vmem:[%s4735_s5 + $0x8] sm:$0xff] %v1925_v61  ;;  %v4223_v5 = vmul.f32 %v4047_v48, %v4880_v17  ;;  %v4883_v61 = vld [vmem:[#allocation18_spill] sm:$0xff]  ;;  %v4885_v19 = vld [vmem:[#allocation19_spill] sm:$0xff] }
 0x382   :  { %2031 = vst [vmem:[%s4735_s5 + $0x10] sm:$0xff] %v1926_v43  ;;  %2032 = vst [vmem:[%s4735_s5 + $0x18] sm:$0xff] %v1927_v20  ;;  %v4227_v11 = vmul.f32 %v4047_v48, %v4881_v36  ;;  %v1862_v37 = vpop.permute.xlu1 %1861  ;;  %v4251_v43 = vmul.f32 %v4055_v53, %v4883_v61  ;;  %v4259_v62 = vmul.f32 %v4055_v53, %v4885_v19  ;;  %v4890_v36 = vld [vmem:[#allocation21_spill] sm:$0xff] }
 0x383   :  { %2033 = vst [vmem:[%s4735_s5 + $0x20] sm:$0xff] %v1928_v0  ;;  %2034 = vst [vmem:[%s4735_s5 + $0x28] sm:$0xff] %v1929_v26  ;;  %v1938_v48 = vadd.f32 %v1862_v37, %v1758_v24  ;;  %v1939_v16 = vadd.f32 %v1862_v37, %v1759_v31  ;;  %v1940_v6 = vadd.f32 %v1862_v37, %v1760_v35  ;;  %v4887_v31 = vld [vmem:[#allocation50_spill] sm:$0xff] }
 0x384   :  { %2035 = vst.msk [vmem:[%s4735_s5 + $0x30] sm:$0xff] %vm864_vm3, %v1930_v34  ;;  %v1941_v38 = vadd.f32 %v1862_v37, %v1761_v45  ;;  %v1942_v20 = vadd.f32 %v1862_v37, %v1762_v32  ;;  %v1943_v56 = vadd.f32 %v1862_v37, %v1763_v55  ;;  %v1944_v0 = vadd.f32 %v1862_v37, %v1764_v14  ;;  %v4886_v34 = vld [vmem:[#allocation49_spill] sm:$0xff]  ;;  %v4888_v55 = vld [vmem:[#allocation20_spill] sm:$0xff] }
 0x385   :  { %v4255_v26 = vmul.f32 %v4055_v53, %v4884_v59  ;;  %v4263_v24 = vmul.f32 %v4055_v53, %v4886_v34  ;;  %v4267_v35 = vmul.f32 %v4055_v53, %v4887_v31  ;;  %2043 = vst [vmem:[%s4735_s5 + $0x70] sm:$0xff] %v1938_v48  ;;  %2044 = vst [vmem:[%s4735_s5 + $0x78] sm:$0xff] %v1939_v16  ;;  %v2460_v45 = vld [vmem:[%s4735_s5 + $0x1b8] sm:$0xff]  ;;  %v2461_v31 = vld [vmem:[%s4735_s5 + $0x1f0] sm:$0xff] }
 0x386   :  { %2045 = vst [vmem:[%s4735_s5 + $0x80] sm:$0xff] %v1940_v6  ;;  %2046 = vst [vmem:[%s4735_s5 + $0x88] sm:$0xff] %v1941_v38  ;;  %v4285_v32 = vmul.f32 %v2460_v45, %v4055_v53  ;;  %v4289_v14 = vmul.f32 %v4049_v27, %v4888_v55  ;;  %v4293_v17 = vmul.f32 %v4049_v27, %v4889_v47  ;;  %v1867_v53 = vpop.permute.xlu0 %1866  ;;  %v1872_v3 = vpop.permute.xlu1 %1871 }
 0x387   :  { %v4297_v7 = vmul.f32 %v4049_v27, %v4890_v36  ;;  %2047 = vst [vmem:[%s4735_s5 + $0x90] sm:$0xff] %v1942_v20  ;;  %2048 = vst [vmem:[%s4735_s5 + $0x98] sm:$0xff] %v1943_v56  ;;  %v1945_v37 = vadd.f32 %v1867_v53, %v4110_v44  ;;  %v1946_v48 = vadd.f32 %v1867_v53, %v4113_v50 }
 0x388   :  { %2049 = vst.msk [vmem:[%s4735_s5 + $0xa0] sm:$0xff] %vm864_vm3, %v1944_v0  ;;  %v1947_v16 = vadd.f32 %v1867_v53, %v4116_v46  ;;  %v1948_v6 = vadd.f32 %v1867_v53, %v4119_v57  ;;  %v1949_v38 = vadd.f32 %v1867_v53, %v4124_v60  ;;  %v1950_v61 = vadd.f32 %v1867_v53, %v4127_v54  ;;  %v4891_v60 = vld [vmem:[#allocation23_spill] sm:$0xff] }
 0x389   :  { %v1951_v20 = vadd.f32 %v1867_v53, %v4132_v9  ;;  %v1952_v56 = vadd.f32 %v1872_v3, %v4135_v25  ;;  %2050 = vst [vmem:[%s4735_s5 + $0xa8] sm:$0xff] %v1945_v37  ;;  %2051 = vst [vmem:[%s4735_s5 + $0xb0] sm:$0xff] %v1946_v48  ;;  %v1953_v44 = vadd.f32 %v1872_v3, %v4138_v4  ;;  %v4892_v9 = vld [vmem:[#allocation51_spill] sm:$0xff]  ;;  %v4895_v53 = vld [vmem:[#allocation26_spill] sm:$0xff] }
 0x38a   :  { %2052 = vst [vmem:[%s4735_s5 + $0xb8] sm:$0xff] %v1947_v16  ;;  %2053 = vst [vmem:[%s4735_s5 + $0xc0] sm:$0xff] %v1948_v6  ;;  %v1954_v50 = vadd.f32 %v1872_v3, %v4141_v23  ;;  %v1955_v46 = vadd.f32 %v1872_v3, %v4144_v2  ;;  %v1956_v57 = vadd.f32 %v1872_v3, %v4147_v40  ;;  %v1877_v2 = vpop.permute.xlu0 %1876  ;;  %v1882_v40 = vpop.permute.xlu1 %1881  ;;  %v4896_v37 = vld [vmem:[#allocation25_spill] sm:$0xff]  ;;  %v4897_v16 = vld [vmem:[#allocation27_spill] sm:$0xff] }
 0x38b   :  { %v4335_v54 = vmul.f32 %v4049_v27, %v4891_v60  ;;  %v4339_v25 = vmul.f32 %v4049_v27, %v4892_v9  ;;  %2054 = vst [vmem:[%s4735_s5 + $0xc8] sm:$0xff] %v1949_v38  ;;  %2055 = vst [vmem:[%s4735_s5 + $0xd0] sm:$0xff] %v1950_v61  ;;  %v1957_v4 = vadd.f32 %v1872_v3, %v4150_v18  ;;  %v4898_v38 = vld [vmem:[#allocation53_spill] sm:$0xff]  ;;  %v4901_v60 = vld [vmem:[#allocation30_spill] sm:$0xff] }
 0x38c   :  { %2056 = vst.msk [vmem:[%s4735_s5 + $0xd8] sm:$0xff] %vm864_vm3, %v1951_v20  ;;  %v1958_v23 = vadd.f32 %v1872_v3, %v4155_v28  ;;  %2057 = vst [vmem:[%s4735_s5 + $0xe0] sm:$0xff] %v1952_v56  ;;  %v1959_v18 = vadd.f32 %v1877_v2, %v4159_v21  ;;  %v1960_v28 = vadd.f32 %v1877_v2, %v4163_v29  ;;  %v4899_v20 = vld [vmem:[#allocation54_spill] sm:$0xff]  ;;  %v4902_v9 = vld [vmem:[#allocation29_spill] sm:$0xff] }
 0x38d   :  { %2058 = vst [vmem:[%s4735_s5 + $0xe8] sm:$0xff] %v1953_v44  ;;  %2059 = vst [vmem:[%s4735_s5 + $0xf0] sm:$0xff] %v1954_v50  ;;  %v1961_v0 = vadd.f32 %v1877_v2, %v4167_v1  ;;  %v1962_v59 = vadd.f32 %v1877_v2, %v4171_v30  ;;  %v1963_v19 = vadd.f32 %v1877_v2, %v4175_v39  ;;  %v2462_v44 = vld [vmem:[%s4735_s5 + $0x228] sm:$0xff] }
 0x38e   :  { %2060 = vst [vmem:[%s4735_s5 + $0xf8] sm:$0xff] %v1955_v46  ;;  %2061 = vst [vmem:[%s4735_s5 + $0x100] sm:$0xff] %v1956_v57  ;;  %v1964_v34 = vadd.f32 %v1877_v2, %v4179_v42  ;;  %v1965_v21 = vadd.f32 %v1877_v2, %v4189_v51  ;;  %v1966_v29 = vadd.f32 %v1882_v40, %v4195_v10  ;;  %v4893_v51 = vld [vmem:[#allocation52_spill] sm:$0xff] }
 0x38f   :  { %2062 = vst [vmem:[%s4735_s5 + $0x108] sm:$0xff] %v1957_v4  ;;  %2063 = vst.msk [vmem:[%s4735_s5 + $0x110] sm:$0xff] %vm864_vm3, %v1958_v23  ;;  %v1967_v1 = vadd.f32 %v1882_v40, %v4199_v49  ;;  %v1968_v30 = vadd.f32 %v1882_v40, %v4203_v22  ;;  %v1969_v39 = vadd.f32 %v1882_v40, %v4207_v33  ;;  %v1892_v55 = vpop.permute.xlu1 %1891  ;;  %v4900_v46 = vld [vmem:[#allocation28_spill] sm:$0xff]  ;;  %v4903_v4 = vld [vmem:[#allocation31_spill] sm:$0xff] }
 0x390   :  { %2064 = vst [vmem:[%s4735_s5 + $0x118] sm:$0xff] %v1959_v18  ;;  %2065 = vst [vmem:[%s4735_s5 + $0x120] sm:$0xff] %v1960_v28  ;;  %v1970_v42 = vadd.f32 %v1882_v40, %v4223_v5  ;;  %v1805_v10 = vmul.f32 %v4049_v27, %v4893_v51  ;;  %v1806_v45 = vmul.f32 %v2461_v31, %v4049_v27  ;;  %v1887_v27 = vpop.permute.xlu0 %1886  ;;  %v4904_v23 = vld [vmem:[#allocation55_spill] sm:$0xff] }
 0x391   :  { %2066 = vst [vmem:[%s4735_s5 + $0x128] sm:$0xff] %v1961_v0  ;;  %2067 = vst [vmem:[%s4735_s5 + $0x130] sm:$0xff] %v1962_v59  ;;  %v1971_v49 = vadd.f32 %v1882_v40, %v4227_v11  ;;  %v1972_v22 = vadd.f32 %v1882_v40, %v4233_v12  ;;  %v1973_v33 = vadd.f32 %v1887_v27, %v4237_v63  ;;  %v4905_v40 = vld [vmem:[#allocation56_spill] sm:$0xff] }
 0x392   :  { %2068 = vst [vmem:[%s4735_s5 + $0x138] sm:$0xff] %v1963_v19  ;;  %2069 = vst [vmem:[%s4735_s5 + $0x140] sm:$0xff] %v1964_v34  ;;  %v1974_v5 = vadd.f32 %v1887_v27, %v4251_v43  ;;  %v1975_v11 = vadd.f32 %v1887_v27, %v4255_v26  ;;  %v1976_v12 = vadd.f32 %v1887_v27, %v4259_v62 }
 0x393   :  { %2070 = vst.msk [vmem:[%s4735_s5 + $0x148] sm:$0xff] %vm864_vm3, %v1965_v21  ;;  %2071 = vst [vmem:[%s4735_s5 + $0x150] sm:$0xff] %v1966_v29  ;;  %v1977_v47 = vadd.f32 %v1887_v27, %v4263_v24  ;;  %v1978_v63 = vadd.f32 %v1887_v27, %v4267_v35  ;;  %v1979_v43 = vadd.f32 %v1887_v27, %v4285_v32  ;;  %v2463_v21 = vld [vmem:[%s4735_s5 + $0x260] sm:$0xff]  ;;  %v4906_v27 = vld [vmem:[#allocation32_spill] sm:$0xff] }
 0x394   :  { %2072 = vst [vmem:[%s4735_s5 + $0x158] sm:$0xff] %v1967_v1  ;;  %2073 = vst [vmem:[%s4735_s5 + $0x160] sm:$0xff] %v1968_v30  ;;  %v1980_v26 = vadd.f32 %v1892_v55, %v4289_v14  ;;  %v1981_v62 = vadd.f32 %v1892_v55, %v4293_v17  ;;  %v1982_v24 = vadd.f32 %v1892_v55, %v4297_v7  ;;  %v4894_v14 = vld [vmem:[#allocation24_spill] sm:$0xff] }
 0x395   :  { %2074 = vst [vmem:[%s4735_s5 + $0x168] sm:$0xff] %v1969_v39  ;;  %2075 = vst [vmem:[%s4735_s5 + $0x170] sm:$0xff] %v1970_v42  ;;  %v1983_v35 = vadd.f32 %v1892_v55, %v4335_v54  ;;  %v1984_v32 = vadd.f32 %v1892_v55, %v4339_v25  ;;  %v1807_v36 = vmul.f32 %v4059_v8, %v4894_v14  ;;  %v1897_v28 = vpop.permute.xlu0 %1896  ;;  %v4912_v14 = vld [vmem:[#allocation36_spill] sm:$0xff] }
 0x396   :  { %2076 = vst [vmem:[%s4735_s5 + $0x178] sm:$0xff] %v1971_v49  ;;  %2077 = vst.msk [vmem:[%s4735_s5 + $0x180] sm:$0xff] %vm864_vm3, %v1972_v22  ;;  %v1985_v17 = vadd.f32 %v1892_v55, %v1805_v10  ;;  %v1986_v7 = vadd.f32 %v1892_v55, %v1806_v45  ;;  %v1808_v3 = vmul.f32 %v4059_v8, %v4895_v53  ;;  %v4914_v53 = vld [vmem:[#allocation37_spill] sm:$0xff] }
 0x397   :  { %2078 = vst [vmem:[%s4735_s5 + $0x188] sm:$0xff] %v1973_v33  ;;  %2079 = vst [vmem:[%s4735_s5 + $0x190] sm:$0xff] %v1974_v5  ;;  %v1809_v48 = vmul.f32 %v4059_v8, %v4896_v37  ;;  %v1810_v6 = vmul.f32 %v4059_v8, %v4897_v16  ;;  %v1811_v61 = vmul.f32 %v4059_v8, %v4898_v38  ;;  %v1902_v42 = vpop.permute.xlu1 %1901  ;;  %v4907_v5 = vld [vmem:[#allocation34_spill] sm:$0xff]  ;;  %v4915_v37 = vld [vmem:[#allocation39_spill] sm:$0xff] }
 0x398   :  { %2080 = vst [vmem:[%s4735_s5 + $0x198] sm:$0xff] %v1975_v11  ;;  %2081 = vst [vmem:[%s4735_s5 + $0x1a0] sm:$0xff] %v1976_v12  ;;  %v1812_v56 = vmul.f32 %v4059_v8, %v4899_v20  ;;  %v1813_v50 = vmul.f32 %v2462_v44, %v4059_v8  ;;  %v1814_v57 = vmul.f32 %v4053_v15, %v4900_v46  ;;  %v4908_v12 = vld [vmem:[#allocation33_spill] sm:$0xff]  ;;  %v4916_v16 = vld [vmem:[#allocation59_spill] sm:$0xff] }
 0x399   :  { %2082 = vst [vmem:[%s4735_s5 + $0x1a8] sm:$0xff] %v1977_v47  ;;  %2083 = vst [vmem:[%s4735_s5 + $0x1b0] sm:$0xff] %v1978_v63  ;;  %v1815_v54 = vmul.f32 %v4053_v15, %v4901_v60  ;;  %v1816_v25 = vmul.f32 %v4053_v15, %v4902_v9  ;;  %v1817_v8 = vmul.f32 %v4053_v15, %v4903_v4  ;;  %v4909_v47 = vld [vmem:[#allocation35_spill] sm:$0xff]  ;;  %v4917_v38 = vld [vmem:[#allocation60_spill] sm:$0xff] }
 0x39a   :  { %2084 = vst.msk [vmem:[%s4735_s5 + $0x1b8] sm:$0xff] %vm864_vm3, %v1979_v43  ;;  %2085 = vst [vmem:[%s4735_s5 + $0x1c0] sm:$0xff] %v1980_v26  ;;  %v1818_v2 = vmul.f32 %v4053_v15, %v4904_v23  ;;  %v1819_v18 = vmul.f32 %v4053_v15, %v4905_v40  ;;  %v1987_v0 = vadd.f32 %v1897_v28, %v1807_v36  ;;  %v4910_v43 = vld [vmem:[#allocation57_spill] sm:$0xff]  ;;  %v2465_v46 = vld [vmem:[%s4735_s5 + $0x2d0] sm:$0xff] }
 0x39b   :  { %2086 = vst [vmem:[%s4735_s5 + $0x1c8] sm:$0xff] %v1981_v62  ;;  %2087 = vst [vmem:[%s4735_s5 + $0x1d0] sm:$0xff] %v1982_v24  ;;  %v1988_v59 = vadd.f32 %v1897_v28, %v1808_v3  ;;  %v1989_v19 = vadd.f32 %v1897_v28, %v1809_v48  ;;  %v1990_v34 = vadd.f32 %v1897_v28, %v1810_v6  ;;  %v4911_v62 = vld [vmem:[#allocation58_spill] sm:$0xff] }
 0x39c   :  { %2088 = vst [vmem:[%s4735_s5 + $0x1d8] sm:$0xff] %v1983_v35  ;;  %2089 = vst [vmem:[%s4735_s5 + $0x1e0] sm:$0xff] %v1984_v32  ;;  %v1820_v29 = vmul.f32 %v2463_v21, %v4053_v15  ;;  %v1991_v1 = vadd.f32 %v1897_v28, %v1811_v61  ;;  %v1992_v30 = vadd.f32 %v1897_v28, %v1812_v56  ;;  %v2464_v35 = vld [vmem:[%s4735_s5 + $0x298] sm:$0xff] }
 0x39d   :  { %2090 = vst [vmem:[%s4735_s5 + $0x1e8] sm:$0xff] %v1985_v17  ;;  %2091 = vst.msk [vmem:[%s4735_s5 + $0x1f0] sm:$0xff] %vm864_vm3, %v1986_v7  ;;  %v1993_v39 = vadd.f32 %v1897_v28, %v1813_v50  ;;  %v1994_v15 = vadd.f32 %v1902_v42, %v1814_v57  ;;  %v1995_v51 = vadd.f32 %v1902_v42, %v1815_v54  ;;  %v4913_v17 = vld [vmem:[#allocation38_spill] sm:$0xff]  ;;  %v1907_v20 = vpop.permute.xlu0 %1906  ;;  %v4918_v28 = vld [vmem:[#allocation40_spill] sm:$0xff] }
 0x39e   :  { %2092 = vst [vmem:[%s4735_s5 + $0x1f8] sm:$0xff] %v1987_v0  ;;  %2093 = vst [vmem:[%s4735_s5 + $0x200] sm:$0xff] %v1988_v59  ;;  %v1996_v10 = vadd.f32 %v1902_v42, %v1816_v25  ;;  %v1997_v31 = vadd.f32 %v1902_v42, %v1817_v8  ;;  %v1998_v45 = vadd.f32 %v1902_v42, %v1818_v2  ;;  %v4919_v59 = vld [vmem:[#allocation42_spill] sm:$0xff] }
 0x39f   :  { %2094 = vst [vmem:[%s4735_s5 + $0x208] sm:$0xff] %v1989_v19  ;;  %2095 = vst [vmem:[%s4735_s5 + $0x210] sm:$0xff] %v1990_v34  ;;  %v1999_v49 = vadd.f32 %v1902_v42, %v1819_v18  ;;  %v2000_v22 = vadd.f32 %v1902_v42, %v1820_v29  ;;  %v1821_v33 = vmul.f32 %v4072_v58, %v4906_v27  ;;  %v1912_v25 = vpop.permute.xlu1 %1911  ;;  %v4920_v34 = vld [vmem:[#allocation41_spill] sm:$0xff]  ;;  %v4921_v29 = vld [vmem:[#allocation43_spill] sm:$0xff] }
 0x3a0   :  { %2096 = vst [vmem:[%s4735_s5 + $0x218] sm:$0xff] %v1991_v1  ;;  %2097 = vst [vmem:[%s4735_s5 + $0x220] sm:$0xff] %v1992_v30  ;;  %v1822_v11 = vmul.f32 %v4072_v58, %v4907_v5  ;;  %v1823_v55 = vmul.f32 %v4072_v58, %v4908_v12  ;;  %v1824_v63 = vmul.f32 %v4072_v58, %v4909_v47  ;;  %v4922_v30 = vld [vmem:[#allocation61_spill] sm:$0xff]  ;;  %v4923_v42 = vld [vmem:[#allocation62_spill] sm:$0xff] }
 0x3a1   :  { %2098 = vst.msk [vmem:[%s4735_s5 + $0x228] sm:$0xff] %vm864_vm3, %v1993_v39  ;;  %2099 = vst [vmem:[%s4735_s5 + $0x230] sm:$0xff] %v1994_v15  ;;  %v1825_v26 = vmul.f32 %v4072_v58, %v4910_v43  ;;  %v1826_v24 = vmul.f32 %v4072_v58, %v4911_v62  ;;  %v1827_v32 = vmul.f32 %v2464_v35, %v4072_v58  ;;  %v2469_v27 = vld [vmem:[%s4735_s5 + $0x328] sm:$0xff]  ;;  %v4925_v47 = vld [vmem:[#allocation64_spill] sm:$0xff] }
 0x3a2   :  { %2100 = vst [vmem:[%s4735_s5 + $0x238] sm:$0xff] %v1995_v51  ;;  %2101 = vst [vmem:[%s4735_s5 + $0x240] sm:$0xff] %v1996_v10  ;;  %v1828_v36 = vmul.f32 %v4057_v13, %v4912_v14  ;;  %v1829_v7 = vmul.f32 %v4057_v13, %v4913_v17  ;;  %v1830_v3 = vmul.f32 %v4057_v13, %v4914_v53  ;;  %v2466_v51 = vld [vmem:[%s4735_s5 + $0x310] sm:$0xff]  ;;  %v2470_v5 = vld [vmem:[%s4735_s5 + $0x308] sm:$0xff] }
 0x3a3   :  { %2102 = vst [vmem:[%s4735_s5 + $0x248] sm:$0xff] %v1997_v31  ;;  %2103 = vst [vmem:[%s4735_s5 + $0x250] sm:$0xff] %v1998_v45  ;;  %v1831_v48 = vmul.f32 %v4057_v13, %v4915_v37  ;;  %v1832_v6 = vmul.f32 %v4057_v13, %v4916_v16  ;;  %v1833_v61 = vmul.f32 %v4057_v13, %v4917_v38  ;;  %v2467_v31 = vld [vmem:[%s4735_s5 + $0x318] sm:$0xff]  ;;  %v4924_v12 = vld [vmem:[#allocation63_spill] sm:$0xff] }
 0x3a4   :  { %2104 = vst [vmem:[%s4735_s5 + $0x258] sm:$0xff] %v1999_v49  ;;  %2105 = vst.msk [vmem:[%s4735_s5 + $0x260] sm:$0xff] %vm864_vm3, %v2000_v22  ;;  %v2001_v58 = vadd.f32 %v1907_v20, %v1821_v33  ;;  %v2002_v56 = vadd.f32 %v1907_v20, %v1822_v11  ;;  %v2003_v44 = vadd.f32 %v1907_v20, %v1823_v55  ;;  %v2468_v49 = vld [vmem:[%s4735_s5 + $0x320] sm:$0xff] }
 0x3a5   :  { %v2004_v50 = vadd.f32 %v1907_v20, %v1824_v63  ;;  %v1834_v57 = vmul.f32 %v2465_v46, %v4057_v13  ;;  %v2005_v60 = vadd.f32 %v1907_v20, %v1825_v26  ;;  %v2006_v54 = vadd.f32 %v1907_v20, %v1826_v24  ;;  %v2471_v43 = vld [vmem:[%s4735_s5 + $0x340] sm:$0xff] }
 0x3a6   :  { %v2007_v9 = vadd.f32 %v1907_v20, %v1827_v32  ;;  %2106 = vst [vmem:[%s4735_s5 + $0x268] sm:$0xff] %v2001_v58  ;;  %2107 = vst [vmem:[%s4735_s5 + $0x270] sm:$0xff] %v2002_v56  ;;  %v2008_v13 = vadd.f32 %v1912_v25, %v1828_v36  ;;  %v2009_v4 = vadd.f32 %v1912_v25, %v1829_v7 }
 0x3a7   :  { %2108 = vst [vmem:[%s4735_s5 + $0x278] sm:$0xff] %v2003_v44  ;;  %2109 = vst [vmem:[%s4735_s5 + $0x280] sm:$0xff] %v2004_v50  ;;  %v2010_v8 = vadd.f32 %v1912_v25, %v1830_v3  ;;  %v2011_v23 = vadd.f32 %v1912_v25, %v1831_v48  ;;  %v2012_v2 = vadd.f32 %v1912_v25, %v1832_v6  ;;  %v1922_v62 = vpop.permute.xlu1 %1921 }
 0x3a8   :  { %2110 = vst [vmem:[%s4735_s5 + $0x288] sm:$0xff] %v2005_v60  ;;  %2111 = vst [vmem:[%s4735_s5 + $0x290] sm:$0xff] %v2006_v54  ;;  %v2013_v40 = vadd.f32 %v1912_v25, %v1833_v61  ;;  %v2014_v18 = vadd.f32 %v1912_v25, %v1834_v57  ;;  %v1835_v0 = vmul.f32 %v4121_v41, %v4918_v28  ;;  %v1917_v24 = vpop.permute.xlu0 %1916 }
 0x3a9   :  { %2112 = vst.msk [vmem:[%s4735_s5 + $0x298] sm:$0xff] %vm864_vm3, %v2007_v9  ;;  %2113 = vst [vmem:[%s4735_s5 + $0x2a0] sm:$0xff] %v2008_v13  ;;  %v1836_v19 = vmul.f32 %v4121_v41, %v4919_v59  ;;  %v1837_v21 = vmul.f32 %v4121_v41, %v4920_v34  ;;  %v1838_v1 = vmul.f32 %v4121_v41, %v4921_v29 }
 0x3aa   :  { %2114 = vst [vmem:[%s4735_s5 + $0x2a8] sm:$0xff] %v2009_v4  ;;  %2115 = vst [vmem:[%s4735_s5 + $0x2b0] sm:$0xff] %v2010_v8  ;;  %v1839_v39 = vmul.f32 %v4121_v41, %v4922_v30  ;;  %v1840_v15 = vmul.f32 %v4121_v41, %v4923_v42  ;;  %v1842_v10 = vmul.f32 %v2466_v51, %v4061_v52 }
 0x3ab   :  { %2116 = vst [vmem:[%s4735_s5 + $0x2b8] sm:$0xff] %v2011_v23  ;;  %2117 = vst [vmem:[%s4735_s5 + $0x2c0] sm:$0xff] %v2012_v2  ;;  %v1843_v45 = vmul.f32 %v2467_v31, %v4061_v52  ;;  %v1844_v22 = vmul.f32 %v2468_v49, %v4061_v52  ;;  %v1845_v33 = vmul.f32 %v2469_v27, %v4061_v52 }
 0x3ac   :  { %2118 = vst [vmem:[%s4735_s5 + $0x2c8] sm:$0xff] %v2013_v40  ;;  %2119 = vst.msk [vmem:[%s4735_s5 + $0x2d0] sm:$0xff] %vm864_vm3, %v2014_v18  ;;  %v1841_v11 = vmul.f32 %v2470_v5, %v4121_v41  ;;  %v1846_v55 = vmul.f32 %v4061_v52, %v4924_v12  ;;  %v1847_v63 = vmul.f32 %v4061_v52, %v4925_v47 }
 0x3ad   :  { %v1848_v26 = vmul.f32 %v2471_v43, %v4061_v52  ;;  %v2022_v35 = vadd.f32 %v1922_v62, %v1842_v10  ;;  %v2023_v32 = vadd.f32 %v1922_v62, %v1843_v45  ;;  %v2024_v14 = vadd.f32 %v1922_v62, %v1844_v22 }
 0x3ae   :  { %v2025_v36 = vadd.f32 %v1922_v62, %v1845_v33  ;;  %v2015_v17 = vadd.f32 %v1917_v24, %v1835_v0  ;;  %v2016_v41 = vadd.f32 %v1917_v24, %v1836_v19  ;;  %v2017_v7 = vadd.f32 %v1917_v24, %v1837_v21 }
 0x3af   :  { %v2018_v53 = vadd.f32 %v1917_v24, %v1838_v1  ;;  %v2019_v3 = vadd.f32 %v1917_v24, %v1839_v39  ;;  %v2020_v37 = vadd.f32 %v1917_v24, %v1840_v15  ;;  %v2021_v48 = vadd.f32 %v1917_v24, %v1841_v11  ;;  %2127 = vst [vmem:[%s4735_s5 + $0x310] sm:$0xff] %v2022_v35 }
 0x3b0   :  { %v2026_v16 = vadd.f32 %v1922_v62, %v1846_v55  ;;  %2128 = vst [vmem:[%s4735_s5 + $0x318] sm:$0xff] %v2023_v32  ;;  %2129 = vst [vmem:[%s4735_s5 + $0x320] sm:$0xff] %v2024_v14  ;;  %v2027_v52 = vadd.f32 %v1922_v62, %v1847_v63  ;;  %v2028_v6 = vadd.f32 %v1922_v62, %v1848_v26 }
 0x3b1   :  { %2130 = vst [vmem:[%s4735_s5 + $0x328] sm:$0xff] %v2025_v36  ;;  %2120 = vst [vmem:[%s4735_s5 + $0x2d8] sm:$0xff] %v2015_v17 }
 0x3b2   :  { %2121 = vst [vmem:[%s4735_s5 + $0x2e0] sm:$0xff] %v2016_v41  ;;  %2122 = vst [vmem:[%s4735_s5 + $0x2e8] sm:$0xff] %v2017_v7 }
 0x3b3   :  { %2123 = vst [vmem:[%s4735_s5 + $0x2f0] sm:$0xff] %v2018_v53  ;;  %2124 = vst [vmem:[%s4735_s5 + $0x2f8] sm:$0xff] %v2019_v3 }
 0x3b4   :  { %2125 = vst [vmem:[%s4735_s5 + $0x300] sm:$0xff] %v2020_v37  ;;  %2126 = vst.msk [vmem:[%s4735_s5 + $0x308] sm:$0xff] %vm864_vm3, %v2021_v48 }
 0x3b5   :  { %2131 = vst [vmem:[%s4735_s5 + $0x330] sm:$0xff] %v2026_v16  ;;  %2132 = vst [vmem:[%s4735_s5 + $0x338] sm:$0xff] %v2027_v52 }
 0x3b6   :  { %2133 = vst.msk [vmem:[%s4735_s5 + $0x340] sm:$0xff] %vm864_vm3, %v2028_v6 }

</bundles_post_ra>
